<compile_context>
chip_gen: v6e
topology: v6e:2x2x1
jax: 0.10.0
libtpu: 0.0.40
codegen_flags: <defaults>
</compile_context>

<pallas_src>
import functools
import math

import jax
import jax.numpy as jnp
import numpy as np
from jax.experimental import pallas as pl
from jax.experimental.pallas import tpu as pltpu


# ----------------------------------------------------------------------------
# Hardware detection helpers (generation-aware compute dtype / VMEM budget)
# ----------------------------------------------------------------------------
@functools.lru_cache(maxsize=None)
def _device_kind():
    try:
        return jax.devices()[0].device_kind.lower()
    except Exception:
        return ""


@functools.lru_cache(maxsize=None)
def _bf16_compute_supported():
    # v5e and older have no bf16 VALU/EUP; keep f32 compute there.
    kind = _device_kind()
    return not any(tag in kind for tag in ("v2", "v3", "v4", "v5"))


@functools.lru_cache(maxsize=None)
def _vmem_capacity_bytes():
    try:
        cap = getattr(pltpu.get_tpu_info(), "vmem_capacity_bytes", None)
        if cap:
            return int(cap)
    except Exception:
        pass
    kind = _device_kind()
    if "v7" in kind or "7x" in kind:
        return 64 * 1024 * 1024           # v7x: 64 MiB per TensorCore
    return 128 * 1024 * 1024              # v5e / v6e


# ----------------------------------------------------------------------------
# Packed-output width / batch-tile selection
# ----------------------------------------------------------------------------
def _packed_width(n, d):
    raw = 2 * d + 2 * n + 1               # hagg | tagg | hattn | tattn | score
    return ((raw + 127) // 128) * 128     # lane-dense (multiple of 128)


def _choose_tb_and_vmem(b, n, d, ent_isz, w_isz, q_isz, out_width):
    """Pick the largest batch tile fitting a generation-aware VMEM budget.

    Prefers >=2 grid steps (megacore sharding) and an even step count so the
    'parallel' axis splits evenly across v7x's 2 TensorCores. The footprint
    includes double-buffered I/O AND a conservative estimate of in-kernel f32
    temporaries (per-side processing keeps those to ~one (tb,N,D) slab).
    """
    cap = _vmem_capacity_bytes()
    budget = min(48 * 1024 * 1024, (cap * 3) // 4)

    def step_bytes(t):
        ins = 2 * (2 * t * 2 * n * d * ent_isz      # ent_nb + rel_nb (double-buffered)
                   + t * 2 * n * w_isz              # logic weights
                   + t * d * q_isz)                 # query relation
        outs = 2 * t * out_width * 4
        temps = 3 * t * n * d * 4 + 4 * t * d * 4 + 6 * t * n * 4   # f32 live set
        return ins + outs + temps

    cands = [t for t in range(8, b + 1, 8) if b % t == 0] or [b]
    fit = [t for t in cands if step_bytes(t) <= budget] or [min(cands)]
    even = [t for t in fit if (b // t) >= 2 and (b // t) % 2 == 0]
    multi = [t for t in fit if (b // t) >= 2]
    tb = max(even) if even else (max(multi) if multi else max(fit))
    vmem_limit = int(min(cap - 16 * 1024 * 1024,
                         max(32 * 1024 * 1024, step_bytes(tb) * 3 // 2)))
    return tb, max(vmem_limit, 16 * 1024 * 1024)


# ----------------------------------------------------------------------------
# Kernel bodies
# ----------------------------------------------------------------------------
def _aggregate_side(ent_nb_ref, rel_nb_ref, w_ref, q, side, compute_dtype, inv_sqrt_d):
    """Logic-weighted attention aggregation for one side (head or tail).

    Slices the side directly from the refs so only one side's intermediates are
    live at a time; elementwise math runs in `compute_dtype` (bf16 on v6e/v7x),
    reductions accumulate in f32.
    """
    nb = ent_nb_ref[:, side].astype(compute_dtype)        # (tb, N, D)
    rl = rel_nb_ref[:, side].astype(compute_dtype)        # (tb, N, D)
    ww = w_ref[:, side].astype(jnp.float32)               # (tb, N)

    # use_relation=True: neighbor representation = entity emb + neighbor-rel emb
    u = nb + rl                                           # (tb, N, D) compute_dtype
    # NN attention logits against the query relation (VPU+XLU; too small for MXU)
    logits = jnp.sum((u * q[:, None, :]).astype(jnp.float32), axis=-1) * inv_sqrt_d
    m = jnp.max(logits, axis=-1, keepdims=True)
    e = jnp.exp(logits - m)                               # f32 (EUP)
    # combine with logic weights, renormalize exactly (eps guards all-zero weights;
    # behavioral divergence from the reference which would produce NaN there).
    a = e * ww
    denom = jnp.sum(a, axis=-1, keepdims=True) + 1e-12
    a = a / denom                                         # exact divide (denom is (tb,1))
    agg = jnp.sum(a[:, :, None] * u, axis=1)              # (tb, D) f32 accumulation
    return agg.astype(jnp.float32), a


def lan_score_kernel(ent_nb_ref, rel_nb_ref, w_ref, q_ref, score_ref, *, compute_dtype):
    """Training-path kernel: head/tail aggregation + TransE score only."""
    d = q_ref.shape[-1]
    inv_sqrt_d = 1.0 / math.sqrt(d)
    q = q_ref[...].astype(compute_dtype)                  # (tb, D)
    hagg, _ = _aggregate_side(ent_nb_ref, rel_nb_ref, w_ref, q, 0, compute_dtype, inv_sqrt_d)
    tagg, _ = _aggregate_side(ent_nb_ref, rel_nb_ref, w_ref, q, 1, compute_dtype, inv_sqrt_d)
    # TransE decoder: score = -||h + r - t||_1
    score_ref[...] = -jnp.sum(jnp.abs(hagg + q.astype(jnp.float32) - tagg),
                              axis=-1, keepdims=True)


def lan_full_kernel(ent_nb_ref, rel_nb_ref, w_ref, q_ref, out_ref, *, compute_dtype):
    """Full-output kernel: packed [hagg | tagg | hattn | tattn | score | 0-pad]."""
    d = q_ref.shape[-1]
    n = w_ref.shape[-1]
    inv_sqrt_d = 1.0 / math.sqrt(d)
    q = q_ref[...].astype(compute_dtype)
    hagg, hattn = _aggregate_side(ent_nb_ref, rel_nb_ref, w_ref, q, 0, compute_dtype, inv_sqrt_d)
    tagg, tattn = _aggregate_side(ent_nb_ref, rel_nb_ref, w_ref, q, 1, compute_dtype, inv_sqrt_d)
    score = -jnp.sum(jnp.abs(hagg + q.astype(jnp.float32) - tagg), axis=-1, keepdims=True)

    # Single lane-dense store; wide pieces first, 1-wide score last.
    pieces = [hagg, tagg, hattn, tattn, score]
    pad = out_ref.shape[-1] - (2 * d + 2 * n + 1)
    if pad > 0:
        pieces.append(jnp.zeros((score.shape[0], pad), jnp.float32))
    out_ref[...] = jnp.concatenate(pieces, axis=-1)


# ----------------------------------------------------------------------------
# pallas_call wrappers
# ----------------------------------------------------------------------------
def _lan_call(ent_nb, rel_nb, w, q, *, score_only):
    """ent_nb/rel_nb: (B,2,N,D); w: (B,2,N); q: (B,D)."""
    B, two, N, D = ent_nb.shape
    assert two == 2
    compute_dtype = (jnp.bfloat16
                     if (ent_nb.dtype == jnp.bfloat16 and _bf16_compute_supported())
                     else jnp.float32)
    out_width = 1 if score_only else _packed_width(N, D)
    tb, vmem_limit = _choose_tb_and_vmem(B, N, D, ent_nb.dtype.itemsize,
                                         w.dtype.itemsize, q.dtype.itemsize, out_width)
    assert B % tb == 0
    grid = (B // tb,)

    kernel = functools.partial(lan_score_kernel if score_only else lan_full_kernel,
                               compute_dtype=compute_dtype)

    in_specs = [
        pl.BlockSpec((tb, 2, N, D), lambda i: (i, 0, 0, 0)),
        pl.BlockSpec((tb, 2, N, D), lambda i: (i, 0, 0, 0)),
        pl.BlockSpec((tb, 2, N), lambda i: (i, 0, 0)),
        pl.BlockSpec((tb, D), lambda i: (i, 0)),
    ]
    out_specs = pl.BlockSpec((tb, out_width), lambda i: (i, 0))

    bytes_accessed = int(ent_nb.size * ent_nb.dtype.itemsize
                         + rel_nb.size * rel_nb.dtype.itemsize
                         + w.size * w.dtype.itemsize
                         + q.size * q.dtype.itemsize
                         + B * out_width * 4)
    cost = pl.CostEstimate(flops=int(B * (16 * N * D + 8 * N + 4 * D)),
                           transcendentals=int(B * 2 * N),
                           bytes_accessed=bytes_accessed)

    return pl.pallas_call(
        kernel,
        grid=grid,
        in_specs=in_specs,
        out_specs=out_specs,
        out_shape=jax.ShapeDtypeStruct((B, out_width), jnp.float32),
        compiler_params=pltpu.CompilerParams(
            dimension_semantics=("parallel",),
            vmem_limit_bytes=vmem_limit,
        ),
        cost_estimate=cost,
    )(ent_nb, rel_nb, w, q)


def lan_encode_and_score(ent_nb, rel_nb, w, q):
    """Full outputs: (score, hagg, tagg, hattn, tattn)."""
    _, _, N, D = ent_nb.shape
    packed = _lan_call(ent_nb, rel_nb, w, q, score_only=False)
    hagg = packed[:, :D]
    tagg = packed[:, D:2 * D]
    hattn = packed[:, 2 * D:2 * D + N]
    tattn = packed[:, 2 * D + N:2 * D + 2 * N]
    score = packed[:, 2 * D + 2 * N:2 * D + 2 * N + 1]
    return score, hagg, tagg, hattn, tattn


def lan_score(ent_nb, rel_nb, w, q):
    """Score-only path for training: (B, 1)."""
    return _lan_call(ent_nb, rel_nb, w, q, score_only=True)


# ----------------------------------------------------------------------------
# LAN module in JAX (parameters + glue; hot path is the Pallas kernel above)
# ----------------------------------------------------------------------------
def xavier_normal(key, shape):
    fan_in, fan_out = shape[0], shape[1]
    std = math.sqrt(2.0 / (fan_in + fan_out))
    return std * jax.random.normal(key, shape, dtype=jnp.float32)


def init_lan_params(key, num_entity, num_relation, embedding_dim, dtype=jnp.bfloat16):
    # bf16 HBM storage halves streamed bytes on a memory-bound kernel.
    # NOTE: keep f32 master weights in the optimizer if training numerics matter.
    k1, k2, k3 = jax.random.split(key, 3)
    return {
        # matches torch.nn.Embedding(num_entity + 1, D) with xavier_normal_
        "entity_embedding": xavier_normal(k1, (num_entity + 1, embedding_dim)).astype(dtype),
        "relation_embedding_out": xavier_normal(k2, (num_relation, embedding_dim)).astype(dtype),
        # encoder-side relation embedding (Attention internals not provided)
        "relation_embedding_in": xavier_normal(k3, (num_relation, embedding_dim)).astype(dtype),
    }


def _gather_pair_inputs(params, neighbor_head, neighbor_tail, input_relation,
                        weight_head, weight_tail):
    """Gather embeddings directly into the stacked head/tail layout (fewer, bigger DMAs)."""
    storage = params["entity_embedding"].dtype
    ids = jnp.stack([neighbor_head, neighbor_tail], axis=1)             # (B,2,N,2) int32
    ent_nb = params["entity_embedding"][ids[..., 1]]                    # (B,2,N,D)
    rel_nb = params["relation_embedding_in"][ids[..., 0]]               # (B,2,N,D)
    w = jnp.stack([weight_head, weight_tail], axis=1).astype(storage)   # (B,2,N) bf16
    q = params["relation_embedding_out"][input_relation]                # (B,D)
    return ent_nb, rel_nb, w, q


def lan_forward_pair(params, neighbor_head, neighbor_tail, input_relation,
                     weight_head, weight_tail):
    """LAN.forward() for head & tail sides + TransE decode (full outputs)."""
    ent_nb, rel_nb, w, q = _gather_pair_inputs(
        params, neighbor_head, neighbor_tail, input_relation, weight_head, weight_tail)
    return lan_encode_and_score(ent_nb, rel_nb, w, q)


def lan_score_pair(params, neighbor_head, neighbor_tail, input_relation,
                   weight_head, weight_tail):
    """Score-only fused path for the loss."""
    ent_nb, rel_nb, w, q = _gather_pair_inputs(
        params, neighbor_head, neighbor_tail, input_relation, weight_head, weight_tail)
    return lan_score(ent_nb, rel_nb, w, q)


def transe_score(h, t, r):
    """Origin (non-aggregated) TransE score in plain JAX — XLA fuses this trivially;
    a standalone pallas_call here would be pure launch overhead."""
    return -jnp.sum(jnp.abs(h.astype(jnp.float32) + r.astype(jnp.float32)
                            - t.astype(jnp.float32)), axis=-1, keepdims=True)


def lan_loss(params, feed, margin):
    B = feed["input_relation_ph"].shape[0]
    # Batch pos and neg examples into ONE kernel launch (longer parallel grid,
    # half the pallas_call overhead).
    # NOTE: the head-side query relation is used for both sides (input_relation_pt ==
    # input_relation_ph for a triple, as in the original feed).
    nb_head = jnp.concatenate([feed["neighbor_head_pos"], feed["neighbor_head_neg"]], axis=0)
    nb_tail = jnp.concatenate([feed["neighbor_tail_pos"], feed["neighbor_tail_neg"]], axis=0)
    rel = jnp.concatenate([feed["input_relation_ph"], feed["input_relation_nh"]], axis=0)
    w_head = jnp.concatenate([feed["neighbor_weight_ph"], feed["neighbor_weight_nh"]], axis=0)
    w_tail = jnp.concatenate([feed["neighbor_weight_pt"], feed["neighbor_weight_nt"]], axis=0)

    scores = lan_score_pair(params, nb_head, nb_tail, rel, w_head, w_tail)   # (2B, 1)
    pos_score, neg_score = scores[:B], scores[B:]

    ent = params["entity_embedding"]
    rel_out = params["relation_embedding_out"]
    ph = ent[feed["input_triplet_pos"][:, 0]]
    pt = ent[feed["input_triplet_pos"][:, 2]]
    nh = ent[feed["input_triplet_neg"][:, 0]]
    nt = ent[feed["input_triplet_neg"][:, 2]]
    r_pos = rel_out[feed["input_relation_ph"]]
    r_neg = rel_out[feed["input_relation_nh"]]

    origin_pos = transe_score(ph, pt, r_pos)
    origin_neg = transe_score(nh, nt, r_neg)

    loss = jnp.mean(jax.nn.relu(margin - pos_score + neg_score))
    loss += jnp.mean(jax.nn.relu(margin - origin_pos + origin_neg))
    return loss, pos_score, neg_score


# ----------------------------------------------------------------------------
# Pure-JAX f32 reference (correctness check of the kernel math)
# ----------------------------------------------------------------------------
def ref_encode_and_score(ent_nb, rel_nb, w, q):
    ent_nb = ent_nb.astype(jnp.float32)
    rel_nb = rel_nb.astype(jnp.float32)
    w = w.astype(jnp.float32)
    q = q.astype(jnp.float32)

    def agg(nb, rl, ww):
        u = nb + rl
        logits = jnp.einsum("bnd,bd->bn", u, q) / math.sqrt(q.shape[-1])
        a = jax.nn.softmax(logits, axis=-1) * ww
        a = a / jnp.sum(a, axis=-1, keepdims=True)
        return jnp.einsum("bn,bnd->bd", a, u), a

    h, ha = agg(ent_nb[:, 0], rel_nb[:, 0], w[:, 0])
    t, ta = agg(ent_nb[:, 1], rel_nb[:, 1], w[:, 1])
    s = -jnp.sum(jnp.abs(h + q - t), axis=-1, keepdims=True)
    return s, h, t, ha, ta


# ----------------------------------------------------------------------------
if __name__ == "__main__":
    B = 16                 # batch of triples
    N = 8                  # args.max_neighbor
    D = 32                 # args.embedding_dim
    NUM_ENTITY = 50
    NUM_RELATION = 10
    MARGIN = 1.0           # args.margin

    key = jax.random.PRNGKey(0)
    kp, kd = jax.random.split(key)
    params = init_lan_params(kp, NUM_ENTITY, NUM_RELATION, D)

    ks = jax.random.split(kd, 12)

    def rand_neighbors(k):
        kr, ke = jax.random.split(k)
        rel = jax.random.randint(kr, (B, N, 1), 0, NUM_RELATION)
        ent = jax.random.randint(ke, (B, N, 1), 0, NUM_ENTITY + 1)
        return jnp.concatenate([rel, ent], axis=-1).astype(jnp.int32)

    feed = {
        "neighbor_head_pos": rand_neighbors(ks[0]),
        "neighbor_tail_pos": rand_neighbors(ks[1]),
        "neighbor_head_neg": rand_neighbors(ks[2]),
        "neighbor_tail_neg": rand_neighbors(ks[3]),
        "neighbor_weight_ph": jax.random.uniform(ks[4], (B, N), minval=0.1, maxval=1.0),
        "neighbor_weight_pt": jax.random.uniform(ks[5], (B, N), minval=0.1, maxval=1.0),
        "neighbor_weight_nh": jax.random.uniform(ks[6], (B, N), minval=0.1, maxval=1.0),
        "neighbor_weight_nt": jax.random.uniform(ks[7], (B, N), minval=0.1, maxval=1.0),
        "input_relation_ph": jax.random.randint(ks[8], (B,), 0, NUM_RELATION),
        "input_relation_nh": jax.random.randint(ks[9], (B,), 0, NUM_RELATION),
        "input_triplet_pos": jax.random.randint(ks[10], (B, 3), 0, NUM_ENTITY),
        "input_triplet_neg": jax.random.randint(ks[11], (B, 3), 0, NUM_ENTITY),
    }
    feed["input_relation_pt"] = feed["input_relation_ph"]
    feed["input_relation_nt"] = feed["input_relation_nh"]

    # --- full-output kernel vs. the f32 JAX reference (positive side) ---
    ent_nb, rel_nb, w, q = _gather_pair_inputs(
        params, feed["neighbor_head_pos"], feed["neighbor_tail_pos"],
        feed["input_relation_ph"], feed["neighbor_weight_ph"], feed["neighbor_weight_pt"])

    out = lan_encode_and_score(ent_nb, rel_nb, w, q)
    out = jax.block_until_ready(out)
    ref = ref_encode_and_score(ent_nb, rel_nb, w, q)
    # tolerance covers bf16 elementwise intermediates on v6e/v7x vs. the f32 reference
    for o, r in zip(out, ref):
        np.testing.assert_allclose(np.asarray(o), np.asarray(r), rtol=2e-2, atol=2e-2)

    # --- score-only kernel cross-check ---
    score_only = jax.block_until_ready(lan_score(ent_nb, rel_nb, w, q))
    np.testing.assert_allclose(np.asarray(score_only), np.asarray(ref[0]),
                               rtol=2e-2, atol=2e-2)

    # --- full loss path (pos+neg aggregated scores in one launch + origin TransE) ---
    loss, pos_score, neg_score = lan_loss(params, feed, MARGIN)
    jax.block_until_ready(loss)

    print("KERNEL_OK")
</pallas_src>

<mosaic_0001>
module attributes {stable_mosaic.version = 11 : i64} {
  func.func @lan_full_kernel(%arg0: i32, %arg1: memref<8x2x8x32xbf16, #tpu.memory_space<vmem>>, %arg2: memref<8x2x8x32xbf16, #tpu.memory_space<vmem>>, %arg3: memref<8x2x8xbf16, #tpu.memory_space<vmem>>, %arg4: memref<8x32xbf16, #tpu.memory_space<vmem>>, %arg5: memref<8x128xf32, #tpu.memory_space<vmem>>) attributes {dimension_semantics = [#tpu.dimension_semantics<parallel>], iteration_bounds = array<i64: 2>, scalar_prefetch = 0 : i64, scratch_operands = 0 : i64, tpu.core_type = #tpu.core_type<tc>, window_params = [{transform_indices = @transform_0, window_bounds = array<i64: 8, 2, 8, 32>}, {transform_indices = @transform_1, window_bounds = array<i64: 8, 2, 8, 32>}, {transform_indices = @transform_2, window_bounds = array<i64: 8, 2, 8>}, {transform_indices = @transform_3, window_bounds = array<i64: 8, 32>}, {transform_indices = @transform_4, window_bounds = array<i64: 8, 128>}]} {
    %c0 = arith.constant 0 : index
    %c0_0 = arith.constant 0 : index
    %0 = vector.load %arg4[%c0, %c0_0] : memref<8x32xbf16, #tpu.memory_space<vmem>>, vector<8x32xbf16>
    %c0_1 = arith.constant 0 : index
    %c0_2 = arith.constant 0 : index
    %c0_3 = arith.constant 0 : index
    %c0_4 = arith.constant 0 : index
    %1 = vector.load %arg1[%c0_1, %c0_2, %c0_3, %c0_4] : memref<8x2x8x32xbf16, #tpu.memory_space<vmem>>, vector<8x1x8x32xbf16>
    %2 = vector.shape_cast %1 : vector<8x1x8x32xbf16> to vector<8x8x32xbf16>
    %c0_5 = arith.constant 0 : index
    %c0_6 = arith.constant 0 : index
    %c0_7 = arith.constant 0 : index
    %c0_8 = arith.constant 0 : index
    %3 = vector.load %arg2[%c0_5, %c0_6, %c0_7, %c0_8] : memref<8x2x8x32xbf16, #tpu.memory_space<vmem>>, vector<8x1x8x32xbf16>
    %4 = vector.shape_cast %3 : vector<8x1x8x32xbf16> to vector<8x8x32xbf16>
    %c0_9 = arith.constant 0 : index
    %c0_10 = arith.constant 0 : index
    %c0_11 = arith.constant 0 : index
    %5 = vector.load %arg3[%c0_9, %c0_10, %c0_11] : memref<8x2x8xbf16, #tpu.memory_space<vmem>>, vector<8x1x8xbf16>
    %6 = vector.shape_cast %5 : vector<8x1x8xbf16> to vector<8x8xbf16>
    %7 = arith.extf %6 : vector<8x8xbf16> to vector<8x8xf32>
    %8 = arith.addf %2, %4 : vector<8x8x32xbf16>
    %9 = vector.shape_cast %0 : vector<8x32xbf16> to vector<8x1x32xbf16>
    %10 = vector.broadcast %9 : vector<8x1x32xbf16> to vector<8x8x32xbf16>
    %11 = arith.mulf %8, %10 : vector<8x8x32xbf16>
    %12 = arith.extf %11 : vector<8x8x32xbf16> to vector<8x8x32xf32>
    %cst = arith.constant dense<0.000000e+00> : vector<8x8xf32>
    %13 = vector.multi_reduction <add>, %12, %cst [2] : vector<8x8x32xf32> to vector<8x8xf32>
    %cst_12 = arith.constant 0.176776692 : f32
    %14 = vector.broadcast %cst_12 : f32 to vector<8x8xf32>
    %15 = arith.mulf %13, %14 : vector<8x8xf32>
    %cst_13 = arith.constant dense<0xFF800000> : vector<8xf32>
    %16 = vector.multi_reduction <maximumf>, %15, %cst_13 [1] : vector<8x8xf32> to vector<8xf32>
    %17 = vector.shape_cast %16 : vector<8xf32> to vector<8x1xf32>
    %18 = vector.broadcast %17 : vector<8x1xf32> to vector<8x8xf32>
    %19 = arith.subf %15, %18 : vector<8x8xf32>
    %20 = math.exp %19 : vector<8x8xf32>
    %21 = arith.mulf %20, %7 : vector<8x8xf32>
    %cst_14 = arith.constant dense<0.000000e+00> : vector<8xf32>
    %22 = vector.multi_reduction <add>, %21, %cst_14 [1] : vector<8x8xf32> to vector<8xf32>
    %23 = vector.shape_cast %22 : vector<8xf32> to vector<8x1xf32>
    %cst_15 = arith.constant 9.99999996E-13 : f32
    %24 = vector.broadcast %cst_15 : f32 to vector<8x1xf32>
    %25 = arith.addf %23, %24 : vector<8x1xf32>
    %26 = vector.broadcast %25 : vector<8x1xf32> to vector<8x8xf32>
    %27 = arith.divf %21, %26 : vector<8x8xf32>
    %28 = vector.shape_cast %27 : vector<8x8xf32> to vector<8x8x1xf32>
    %29 = arith.extf %8 : vector<8x8x32xbf16> to vector<8x8x32xf32>
    %30 = vector.broadcast %28 : vector<8x8x1xf32> to vector<8x8x32xf32>
    %31 = arith.mulf %30, %29 : vector<8x8x32xf32>
    %cst_16 = arith.constant dense<0.000000e+00> : vector<8x32xf32>
    %32 = vector.multi_reduction <add>, %31, %cst_16 [1] : vector<8x8x32xf32> to vector<8x32xf32>
    %c0_17 = arith.constant 0 : index
    %c1 = arith.constant 1 : index
    %c0_18 = arith.constant 0 : index
    %c0_19 = arith.constant 0 : index
    %33 = vector.load %arg1[%c0_17, %c1, %c0_18, %c0_19] : memref<8x2x8x32xbf16, #tpu.memory_space<vmem>>, vector<8x1x8x32xbf16>
    %34 = vector.shape_cast %33 : vector<8x1x8x32xbf16> to vector<8x8x32xbf16>
    %c0_20 = arith.constant 0 : index
    %c1_21 = arith.constant 1 : index
    %c0_22 = arith.constant 0 : index
    %c0_23 = arith.constant 0 : index
    %35 = vector.load %arg2[%c0_20, %c1_21, %c0_22, %c0_23] : memref<8x2x8x32xbf16, #tpu.memory_space<vmem>>, vector<8x1x8x32xbf16>
    %36 = vector.shape_cast %35 : vector<8x1x8x32xbf16> to vector<8x8x32xbf16>
    %c0_24 = arith.constant 0 : index
    %c1_25 = arith.constant 1 : index
    %c0_26 = arith.constant 0 : index
    %37 = vector.load %arg3[%c0_24, %c1_25, %c0_26] : memref<8x2x8xbf16, #tpu.memory_space<vmem>>, vector<8x1x8xbf16>
    %38 = vector.shape_cast %37 : vector<8x1x8xbf16> to vector<8x8xbf16>
    %39 = arith.extf %38 : vector<8x8xbf16> to vector<8x8xf32>
    %40 = arith.addf %34, %36 : vector<8x8x32xbf16>
    %41 = vector.shape_cast %0 : vector<8x32xbf16> to vector<8x1x32xbf16>
    %42 = vector.broadcast %41 : vector<8x1x32xbf16> to vector<8x8x32xbf16>
    %43 = arith.mulf %40, %42 : vector<8x8x32xbf16>
    %44 = arith.extf %43 : vector<8x8x32xbf16> to vector<8x8x32xf32>
    %cst_27 = arith.constant dense<0.000000e+00> : vector<8x8xf32>
    %45 = vector.multi_reduction <add>, %44, %cst_27 [2] : vector<8x8x32xf32> to vector<8x8xf32>
    %cst_28 = arith.constant 0.176776692 : f32
    %46 = vector.broadcast %cst_28 : f32 to vector<8x8xf32>
    %47 = arith.mulf %45, %46 : vector<8x8xf32>
    %cst_29 = arith.constant dense<0xFF800000> : vector<8xf32>
    %48 = vector.multi_reduction <maximumf>, %47, %cst_29 [1] : vector<8x8xf32> to vector<8xf32>
    %49 = vector.shape_cast %48 : vector<8xf32> to vector<8x1xf32>
    %50 = vector.broadcast %49 : vector<8x1xf32> to vector<8x8xf32>
    %51 = arith.subf %47, %50 : vector<8x8xf32>
    %52 = math.exp %51 : vector<8x8xf32>
    %53 = arith.mulf %52, %39 : vector<8x8xf32>
    %cst_30 = arith.constant dense<0.000000e+00> : vector<8xf32>
    %54 = vector.multi_reduction <add>, %53, %cst_30 [1] : vector<8x8xf32> to vector<8xf32>
    %55 = vector.shape_cast %54 : vector<8xf32> to vector<8x1xf32>
    %cst_31 = arith.constant 9.99999996E-13 : f32
    %56 = vector.broadcast %cst_31 : f32 to vector<8x1xf32>
    %57 = arith.addf %55, %56 : vector<8x1xf32>
    %58 = vector.broadcast %57 : vector<8x1xf32> to vector<8x8xf32>
    %59 = arith.divf %53, %58 : vector<8x8xf32>
    %60 = vector.shape_cast %59 : vector<8x8xf32> to vector<8x8x1xf32>
    %61 = arith.extf %40 : vector<8x8x32xbf16> to vector<8x8x32xf32>
    %62 = vector.broadcast %60 : vector<8x8x1xf32> to vector<8x8x32xf32>
    %63 = arith.mulf %62, %61 : vector<8x8x32xf32>
    %cst_32 = arith.constant dense<0.000000e+00> : vector<8x32xf32>
    %64 = vector.multi_reduction <add>, %63, %cst_32 [1] : vector<8x8x32xf32> to vector<8x32xf32>
    %65 = arith.extf %0 : vector<8x32xbf16> to vector<8x32xf32>
    %66 = arith.addf %32, %65 : vector<8x32xf32>
    %67 = arith.subf %66, %64 : vector<8x32xf32>
    %68 = math.absf %67 : vector<8x32xf32>
    %cst_33 = arith.constant dense<0.000000e+00> : vector<8xf32>
    %69 = vector.multi_reduction <add>, %68, %cst_33 [1] : vector<8x32xf32> to vector<8xf32>
    %70 = vector.shape_cast %69 : vector<8xf32> to vector<8x1xf32>
    %cst_34 = arith.constant 0.000000e+00 : f32
    %71 = vector.broadcast %cst_34 : f32 to vector<8x1xf32>
    %72 = arith.subf %71, %70 : vector<8x1xf32>
    %cst_35 = arith.constant 0.000000e+00 : f32
    %73 = vector.broadcast %cst_35 : f32 to vector<8x47xf32>
    %74 = tpu.concatenate %32, %64, %27, %59, %72, %73 in 1 : vector<8x32xf32>, vector<8x32xf32>, vector<8x8xf32>, vector<8x8xf32>, vector<8x1xf32>, vector<8x47xf32> -> vector<8x128xf32>
    %c0_36 = arith.constant 0 : index
    %c0_37 = arith.constant 0 : index
    %75 = vector.load %arg5[%c0_36, %c0_37] : memref<8x128xf32, #tpu.memory_space<vmem>>, vector<8x128xf32>
    tpu.vector_store %arg5[%c0_36, %c0_37], %74 {strides = array<i32>} : memref<8x128xf32, #tpu.memory_space<vmem>>, vector<8x128xf32>,
    return
  }
  func.func @transform_0(%arg0: i32) -> (i32, i32, i32, i32) {
    %c0_i32 = arith.constant 0 : i32
    %c0_i32_0 = arith.constant 0 : i32
    %c0_i32_1 = arith.constant 0 : i32
    %c0_i32_2 = arith.constant 0 : i32
    return %arg0, %c0_i32, %c0_i32_0, %c0_i32_1 : i32, i32, i32, i32
  }
  func.func @transform_1(%arg0: i32) -> (i32, i32, i32, i32) {
    %c0_i32 = arith.constant 0 : i32
    %c0_i32_0 = arith.constant 0 : i32
    %c0_i32_1 = arith.constant 0 : i32
    %c0_i32_2 = arith.constant 0 : i32
    return %arg0, %c0_i32, %c0_i32_0, %c0_i32_1 : i32, i32, i32, i32
  }
  func.func @transform_2(%arg0: i32) -> (i32, i32, i32) {
    %c0_i32 = arith.constant 0 : i32
    %c0_i32_0 = arith.constant 0 : i32
    %c0_i32_1 = arith.constant 0 : i32
    return %arg0, %c0_i32, %c0_i32_0 : i32, i32, i32
  }
  func.func @transform_3(%arg0: i32) -> (i32, i32) {
    %c0_i32 = arith.constant 0 : i32
    %c0_i32_0 = arith.constant 0 : i32
    return %arg0, %c0_i32 : i32, i32
  }
  func.func @transform_4(%arg0: i32) -> (i32, i32) {
    %c0_i32 = arith.constant 0 : i32
    %c0_i32_0 = arith.constant 0 : i32
    return %arg0, %c0_i32 : i32, i32
  }
}

</mosaic_0001>

<bundles_post_ra>
// kernel: tpu_custom_call.1
= control target key start
LH: loop header
LB: loop body
LE: loop exit
PB: predicated region body
PF: predicated region fallthrough
CT: control target
= control target key end

     0   :  { %9 = vsyncpa [#allocation3], 0  ;;  %s2996_s0 = inlined_call_operand.hbm [shape: bf16[16,2,8,32], index: 0, kind: input, shape index: {}]   ;;  %s2997_s1 = inlined_call_operand.hbm [shape: bf16[16,2,8,32], index: 1, kind: input, shape index: {}]   ;;  %s2998_s2 = inlined_call_operand.vmem [shape: bf16[16,2,8], index: 2, kind: input, shape index: {}]   ;;  %s2999_s3 = inlined_call_operand.vmem [shape: bf16[16,32], index: 3, kind: input, shape index: {}]   ;;  %s3000_s4 = inlined_call_operand.hbm [shape: f32[16,128], index: 4, kind: output, shape index: {}]  }
   0x1   :  { %11 = vsyncpa [#allocation3 + $0x1], 0 }
   0x2   :  { %12 = vsyncpa [#allocation6], 0 }
   0x3   :  { %14 = vsyncpa [#allocation6 + $0x1], 0 }
   0x4   :  { %15 = vsyncpa [#allocation4], 0 }
   0x5   :  { %17 = vsyncpa [#allocation4 + $0x1], 0  ;;  %s2147_s15 = smov 0   ;;  %s2149_s16 = smov 0  }
   0x6   :  { %s2151_s17 = smov 0   ;;  %s2153_s18 = smov 0  }
   0x7 LB: > { %s2168_s19 = sadd.s32 4294967295, %s2112_s18   ;;  %s1819_s20 = sadd.s32 4294967294, %s2112_s18   ;;  %s2112_s18 = sphi %s2153_s18, %s3028_s18   ;;  %s2108_s17 = sphi %s2151_s17, %s3027_s17   ;;  %s2104_s16 = sphi %s2149_s16, %s3026_s16   ;;  %s2100_s15 = sphi %s2147_s15, %s3025_s15  }
   0x8   : > { %s2172_s21 = sadd.s32 1, %s2112_s18   ;;  %s30_s22 = sadd.s32 1, %s2108_s17 }
   0x9   : > { %s27_s23 = ssub.s32 %s2112_s18, %s2172_s21  ;;  %p37_p0 = scmp.ne.s32.totalorder %s2108_s17, %s2104_s16 }
   0xa   : > { %p28_p1 = scmp.eq.s32.totalorder %s27_s23, 0  ;;  %p38_p2 = scmp.eq.s32.totalorder %s2112_s18, 0 }
   0xb   : > { %p43_p3 = scmp.ne.s32.totalorder %s2104_s16, %s2100_s15  ;;  %p44_p4 = scmp.eq.s32.totalorder %s2168_s19, 0 }
   0xc   : > { %s2184_s24 = scalar_select %p28_p1, %s2108_s17, %s30_s22  }
   0xd   : > { %p2186_p5 = por %p38_p2, %p37_p0  ;;  %p2190_p6 = por %p44_p4, %p43_p3 }
   0xe   : > { %p145_p7 = scmp.eq.s32.totalorder %s2168_s19, 1  ;;  %p151_p8 = scmp.eq.s32.totalorder %s1819_s20, 1 }
   0xf   : > { %s3010_s26 = scalar_select %p2190_p6, 1, 0 }
  0x10   : > { %p1881_p10 = scmp.lt.s32.totalorder %s2112_s18, 2  ;;  %p2197_p11 = por %p145_p7, %p37_p0 }
  0x11   : > { %p2201_p12 = por %p151_p8, %p43_p3  ;;  %s2206_s29 = sand.u32 1, %s2108_s17  }
  0x12   : > { %s3011_s27 = scalar_select %p2197_p11, 1, 0 }
  0x13   : > { %s3012_s28 = scalar_select %p2201_p12, 1, 0 }
  0x14   : > { %s1861_s30 = sshll.u32 %s2112_s18, 10  ;;  %s1822_s5 = sshll.u32 %s2206_s29, 6 }
  0x15   : > { %s2215_s8 = scalar_lea.hbm %s2996_s0, %s1861_s30  ;;  %s175_s9 = scalar_lea.vmem [#allocation2], %s1822_s5 }
  0x16   : > { %s183_s10 = sshll.u32 %s175_s9, 4  ;;  %p2221_p13 = pnand %p1881_p10, %p2186_p5  ;;  %s2225_s10 = int_to_ptr.vmem [resolvable:$true] %s183_s10 }
  0x17   : > { %s172_s12 = scalar_lea.sflag [#allocation3], %s2206_s29  ;;  %s1988_s13 = scalar_lea.hbm %s2215_s8, 1024 }
  0x18   : > { %p1989_p0 = scmp.ne.s32.totalorder %s2215_s8, %s1988_s13  ;;  %p1990_p1 = pneg %p2221_p13 }
  0x19   : > { %s1993_s22 = scalar_lea.hbm %s2996_s0, 2048  ;;  %p1994_p4 = scmp.lt.s32.totalorder %s2215_s8, %s2996_s0 }
  0x1a   : > { %p1991_p2 = pnand %p1990_p1, %p1989_p0  ;;  %p1995_p5 = scmp.lt.s32.totalorder %s1993_s22, %s1988_s13 }
  0x1c   : > { %p1992_p3 = pneg %p1991_p2  ;;  %p1996_p7 = por %p1995_p5, %p1994_p4 }
  0x1e   : > { %p1997_p8 = pnand %p1996_p7, %p1992_p3 }
  0x20   : > { %2000 = shalt.err (!%p1997_p8)
}
  0x21   : > { %s2001_s6 = scalar_lea.vmem %s2225_s10, 1024  ;;  %s2114_s7 = smov [#allocation2]  }
  0x22   : > { %p2002_p10 = scmp.ne.s32.totalorder %s2225_s10, %s2001_s6  ;;  %s2006_s9 = sshll.u32 %s2114_s7, 4  ;;  %s2007_s9 = int_to_ptr.vmem [resolvable:$false] %s2006_s9 }
  0x23   : > { %s2008_s14 = scalar_lea.vmem %s2007_s9, 2048  ;;  %p2009_p9 = scmp.lt.s32.totalorder %s2225_s10, %s2007_s9 }
  0x24   : > { %p2004_p0 = pnand %p2002_p10, %p1990_p1  ;;  %p2010_p12 = scmp.lt.s32.totalorder %s2008_s14, %s2001_s6 }
  0x26   : > { %p2005_p2 = pneg %p2004_p0  ;;  %p2011_p11 = por %p2010_p12, %p2009_p9 }
  0x28   : > { %p2012_p4 = pnand %p2011_p11, %p2005_p2 }
  0x2a   : > { %2015 = shalt.err (!%p2012_p4)
}
  0x2b   : > { %s2115_s13 = smov 64   ;;  %s2116_s20 = smov 4  }
  0x2c   : > { %1873 = dma.hbm_to_vmem [thread:$0]  (!%p2221_p13), %s2215_s8, 1024, %s2225_s10, %s172_s12, %s2115_s13, %s2115_s13, %s2116_s20  }
  0x2d   : > { %p1830_p9 = scmp.ge.s32.totalorder %s2112_s18, 1  ;;  %p228_p11 = scmp.lt.s32.totalorder %s2112_s18, 3 }
  0x2e   : > { %s2268_s6 = scalar_lea.hbm %s2997_s1, %s1861_s30  ;;  %s197_s7 = scalar_lea.vmem [#allocation5], %s1822_s5 }
  0x2f   : > { %p2259_p12 = pnand %p1830_p9, %p228_p11  ;;  %s205_s9 = sshll.u32 %s197_s7, 4  ;;  %s2272_s9 = int_to_ptr.vmem [resolvable:$true] %s205_s9 }
  0x30   : > { %s194_s8 = scalar_lea.sflag [#allocation6], %s2206_s29  ;;  %s2016_s10 = scalar_lea.hbm %s2268_s6, 1024 }
  0x31   : > { %p2017_p3 = scmp.ne.s32.totalorder %s2268_s6, %s2016_s10  ;;  %s2021_s30 = scalar_lea.hbm %s2997_s1, 2048 }
  0x32   : > { %p2022_p8 = scmp.lt.s32.totalorder %s2268_s6, %s2997_s1  ;;  %p2023_p10 = scmp.lt.s32.totalorder %s2021_s30, %s2016_s10 }
  0x33   : > { %p2019_p5 = pnand %p2017_p3, %p1990_p1 }
  0x34   : > { %p2024_p0 = por %p2023_p10, %p2022_p8 }
  0x35   : > { %p2020_p7 = pneg %p2019_p5 }
  0x37   : > { %p2025_p2 = pnand %p2024_p0, %p2020_p7 }
  0x39   : > { %2028 = shalt.err (!%p2025_p2)
}
  0x3a   : > { %s2029_s29 = scalar_lea.vmem %s2272_s9, 1024  ;;  %s2117_s5 = smov [#allocation5]  }
  0x3b   : > { %p2030_p4 = scmp.ne.s32.totalorder %s2272_s9, %s2029_s29  ;;  %s2034_s7 = sshll.u32 %s2117_s5, 4  ;;  %s2035_s7 = int_to_ptr.vmem [resolvable:$false] %s2034_s7 }
  0x3c   : > { %s2036_s12 = scalar_lea.vmem %s2035_s7, 2048  ;;  %p2037_p3 = scmp.lt.s32.totalorder %s2272_s9, %s2035_s7 }
  0x3d   : > { %p2032_p9 = pnand %p2030_p4, %p1990_p1  ;;  %p2038_p5 = scmp.lt.s32.totalorder %s2036_s12, %s2029_s29 }
  0x3f   : > { %p2033_p11 = pneg %p2032_p9  ;;  %p2039_p6 = por %p2038_p5, %p2037_p3 }
  0x41   : > { %p2040_p8 = pnand %p2039_p6, %p2033_p11 }
  0x43   : > { %2043 = shalt.err (!%p2040_p8)
}
  0x44   : > { %1876 = dma.hbm_to_vmem [thread:$0]  (!%p2221_p13), %s2268_s6, 1024, %s2272_s9, %s194_s8, %s2115_s13, %s2115_s13, %s2116_s20  }
  0x45   : > { %232 = sbr.rel (%p2259_p12) target bundleno = 1081 (0x439), region = 36 }
  0x4a   : > { %s2303_s10 = sand.u32 1, %s2104_s16   ;;  %p3015_p6 = scmp.ne.s32.totalorder %s3010_s26, 0 }
  0x4b   : > { %s1831_s14 = sshll.u32 %s2303_s10, 6  ;;  %s235_s30 = scalar_lea.sflag [#allocation3], %s2303_s10 }
  0x4c   : > { %s2307_s23 = scalar_lea.vmem [#allocation2], %s1831_s14 }
  0x4d   : > { %2087 = dma.done.wait (%p3015_p6), %s235_s30, 1024  }
  0x4e   : > { %2089 = vsyncadd (%p3015_p6), %s235_s30, 4294966272  ;;  %s244_s11 = scalar_lea.sflag [#allocation6], %s2303_s10  ;;  %s2314_s13 = scalar_lea.vmem [#allocation5], %s1831_s14 }
  0x4f   : > { %2091 = dma.done.wait (%p3015_p6), %s244_s11, 1024  }
  0x50   : > { %2093 = vsyncadd (%p3015_p6), %s244_s11, 4294966272  ;;  %p292_p13 = scmp.lt.s32.totalorder %s2168_s19, 1  ;;  %v341_v0 = vlaneseq  ;;  %v2118_v1 = vmov 1966171168   ;;  %v297_v7 = vld [vmem:[%s2307_s23] sm:$0xf] }
  0x51   : > { %v339_v2 = vunpack.c.l.s4 %v2118_v1  ;;  %v305_v9 = vld [vmem:[%s2314_s13] sm:$0xf]  ;;  %v299_v11 = vld [vmem:[%s2307_s23 + $0x10] sm:$0xf]  ;;  %v1840_v14 = vld [vmem:[%s2307_s23 + $0x4] sm:$0xf] }
  0x52   : > { %s293_s20 = scalar_select %p292_p13, %s2168_s19, 1  ;;  %v2323_v3 = vshrl.u32 %v341_v0, 7  ;;  %v307_v12 = vld [vmem:[%s2314_s13 + $0x10] sm:$0xf]  ;;  %v1848_v15 = vld [vmem:[%s2314_s13 + $0x4] sm:$0xf]  ;;  %v2343_v21 = vadd.bf16 %v305_v9, %v297_v7 }
  0x53   : > { %v340_v4 = vunpack.c.0.s8 %v339_v2  ;;  %v1841_v19 = vld [vmem:[%s2307_s23 + $0xc] sm:$0xf]  ;;  %v2345_v22 = vadd.bf16 %v307_v12, %v299_v11  ;;  %v298_v23 = vld [vmem:[%s2307_s23 + $0x8] sm:$0xf]  ;;  %v2350_v28 = vadd.bf16 %v1848_v15, %v1840_v14  ;;  %v1842_v31 = vld [vmem:[%s2307_s23 + $0x14] sm:$0xf] }
  0x54   : > { %s1835_s22 = sshll.u32 %s293_s20, 2  ;;  %v2334_v8 = vsub.s32 0, %v2323_v3  ;;  %v1849_v20 = vld [vmem:[%s2314_s13 + $0xc] sm:$0xf]  ;;  %v306_v24 = vld [vmem:[%s2314_s13 + $0x8] sm:$0xf] }
  0x55   : > { %s2328_s9 = scalar_lea.vmem %s2999_s3, %s1835_s22  ;;  %v343_v5 = vsub.s32 %v340_v4, %v2323_v3  ;;  %v2352_v30 = vadd.bf16 %v1849_v20, %v1841_v19  ;;  %v1850_v32 = vld [vmem:[%s2314_s13 + $0x14] sm:$0xf]  ;;  %v2358_v39 = vadd.bf16 %v306_v24, %v298_v23  ;;  %v301_v48 = vld [vmem:[%s2307_s23 + $0x20] sm:$0xf]  ;;  %v1844_v58 = vld [vmem:[%s2307_s23 + $0x24] sm:$0xf] }
  0x56   : > { %v1987_v6 = vld.sshfl [vmem:[%s2328_s9] sm:$0x33 pattern:$0x75316420]  ;;  %v2364_v47 = vadd.bf16 %v1850_v32, %v1842_v31  ;;  %v1852_v59 = vld [vmem:[%s2314_s13 + $0x24] sm:$0xf] }
  0x57   : > { %v352_v10 = vrot.slane %v1987_v6, %v343_v5  ;;  %v345_v13 = vcombine.high %v1987_v6, %v1987_v6  ;;  %v309_v49 = vld [vmem:[%s2314_s13 + $0x20] sm:$0xf]  ;;  %vm482_vm0 = vcmask 261120   ;;  %v310_v6 = vld [vmem:[%s2314_s13 + $0x28] sm:$0xf]  ;;  %v2386_v9 = vadd.bf16 %v1852_v59, %v1844_v58  ;;  %s1834_s8 = sshll.u32 %s2168_s19, 3 }
  0x58   : > { %v2378_v60 = vadd.bf16 %v309_v49, %v301_v48  ;;  %p288_p1 = scmp.lt.s32.totalorder %s1834_s8, 15  ;;  %vm557_vm1 = vcmask 1041409   ;;  %vm559_vm2 = vcmask 1042434   ;;  %vm561_vm3 = vcmask 1043459   ;;  %s2120_s7 = smov 32  }
  0x59   : > { %v1836_v16 = vpack.i.b16 %v352_v10, %v352_v10  ;;  %v359_v17 = vrot.slane %v345_v13, %v343_v5  ;;  %v363_v18 = vunpack.i.h.s16 %v352_v10  ;;  %v360_v25 = vcombine.high %v352_v10, %v352_v10  ;;  %v302_v5 = vld [vmem:[%s2307_s23 + $0x28] sm:$0xf]  ;;  %s1833_s12 = sshll.u32 %s2303_s10, 3  ;;  %s1857_s14 = sshll.u32 %s2168_s19, 7 }
  0x5a   : > { %v2394_v19 = vadd.bf16 %v310_v6, %v302_v5  ;;  %s3030_s8 = smov (!%p288_p1, %s1834_s8), 15  ;;  %vm563_vm4 = vcmask 1044484   ;;  %vm565_vm5 = vcmask 1045509   ;;  %vm567_vm6 = vcmask 1046534   ;;  %s284_s30 = scalar_lea.vmem [#allocation7], %s1833_s12 }
  0x5b   : > { %v381_v26 = vrot.slane %v1836_v16, %v2334_v8  ;;  %v1837_v27 = vpack.i.b16 %v359_v17, %v359_v17  ;;  %v371_v29 = vpack.i.b16 %v363_v18, %v363_v18  ;;  %v1838_v33 = vpack.i.b16 %v360_v25, %v360_v25  ;;  %v300_v16 = vld [vmem:[%s2307_s23 + $0x18] sm:$0xf]  ;;  %s2456_s5 = scalar_lea.vmem %s2998_s2, %s3030_s8  ;;  %s2959_s20 = scalar_lea.hbm %s3000_s4, %s1857_s14 }
  0x5c   : > { %v367_v34 = vunpack.i.h.s16 %v360_v25  ;;  %v365_v35 = vunpack.i.h.s16 %v359_v17  ;;  %v2361_v43 = vcombine.high %v359_v17, %v359_v17  ;;  %v308_v17 = vld [vmem:[%s2314_s13 + $0x18] sm:$0xf]  ;;  %vm569_vm7 = vcmask 1047559   ;;  %s1692_s22 = scalar_lea.sflag [#allocation4], %s2303_s10  ;;  %p3022_p7 = scmp.ne.s32.totalorder %s3011_s27, 0 }
  0x5d   : > { %v411_v36 = vpack.i.b16 %v381_v26, %v381_v26  ;;  %v389_v37 = vrot.slane %v1837_v27, %v2334_v8  ;;  %v385_v38 = vrot.slane %v371_v29, %v2334_v8  ;;  %v397_v40 = vrot.slane %v1838_v33, %v2334_v8  ;;  %v303_v26 = vld [vmem:[%s2307_s23 + $0x30] sm:$0xf]  ;;  %s2121_s19 = smov [#allocation7]  }
  0x5e   : > { %v375_v41 = vpack.i.b16 %v367_v34, %v367_v34  ;;  %v373_v42 = vpack.i.b16 %v365_v35, %v365_v35  ;;  %v1839_v53 = vpack.i.b16 %v2361_v43, %v2361_v43  ;;  %v311_v27 = vld [vmem:[%s2314_s13 + $0x30] sm:$0xf]  ;;  %v2402_v31 = vadd.bf16 %v308_v17, %v300_v16  ;;  %s2048_s6 = sshll.u32 %s2121_s19, 4  ;;  %s2049_s6 = int_to_ptr.vmem [resolvable:$false] %s2048_s6 }
  0x5f   : > { %v416_v44 = vrot.slane %v411_v36, %v2334_v8  ;;  %v425_v45 = vpack.i.b16 %v389_v37, %v389_v37  ;;  %v418_v46 = vpack.i.b16 %v385_v38, %v385_v38  ;;  %v439_v50 = vpack.i.b16 %v397_v40, %v397_v40  ;;  %v1843_v37 = vld [vmem:[%s2307_s23 + $0x1c] sm:$0xf] }
  0x60   : > { %v401_v51 = vrot.slane %v375_v41, %v2334_v8  ;;  %v393_v52 = vrot.slane %v373_v42, %v2334_v8  ;;  %v405_v11 = vrot.slane %v1839_v53, %v2334_v8  ;;  %v2406_v36 = vadd.bf16 %v311_v27, %v303_v26  ;;  %v1851_v38 = vld [vmem:[%s2314_s13 + $0x1c] sm:$0xf] }
  0x61   : > { %v466_v54 = vmul.bf16 %v416_v44, %v2343_v21  ;;  %v430_v55 = vrot.slane %v425_v45, %v2334_v8  ;;  %v1008_v56 = vmul.bf16 %v2350_v28, %v416_v44  ;;  %v423_v57 = vrot.slane %v418_v46, %v2334_v8 }
  0x62   : > { %v444_v61 = vrot.slane %v439_v50, %v2334_v8  ;;  %v446_v62 = vpack.i.b16 %v401_v51, %v401_v51  ;;  %v432_v10 = vpack.i.b16 %v393_v52, %v393_v52  ;;  %v453_v35 = vpack.i.b16 %v405_v11, %v405_v11  ;;  %v312_v52 = vld [vmem:[%s2314_s13 + $0x38] sm:$0xf] }
  0x63   : > { %v474_v63 = vunpack.c.l.bf16 %v466_v54  ;;  %v468_v1 = vmul.bf16 %v430_v55, %v2345_v22  ;;  %v1016_v2 = vunpack.c.l.bf16 %v1008_v56  ;;  %v1009_v4 = vmul.bf16 %v2352_v30, %v423_v57  ;;  %v1845_v54 = vld [vmem:[%s2307_s23 + $0x2c] sm:$0xf] }
  0x64   : > { %v467_v7 = vmul.bf16 %v423_v57, %v2358_v39  ;;  %v1010_v15 = vmul.bf16 %v2364_v47, %v430_v55  ;;  %v470_v18 = vmul.bf16 %v444_v61, %v2378_v60  ;;  %v451_v25 = vrot.slane %v446_v62, %v2334_v8  ;;  %v1853_v55 = vld [vmem:[%s2314_s13 + $0x2c] sm:$0xf]  ;;  %v1846_v62 = vld [vmem:[%s2307_s23 + $0x34] sm:$0xf] }
  0x65   : > { %v483_v12 = vsel %vm482_vm0, %v474_v63, 0.0  ;;  %v476_v13 = vunpack.c.l.bf16 %v468_v1  ;;  %v1017_v14 = vunpack.c.l.bf16 %v1009_v4  ;;  %v1024_v23 = vsel %vm482_vm0, %v1016_v2, 0.0  ;;  %v1854_v63 = vld [vmem:[%s2314_s13 + $0x34] sm:$0xf] }
  0x66   : > { %484 = vadd.xlane.f32.xlu0 %v483_v12  ;;  %v475_v24 = vunpack.c.l.bf16 %v467_v7  ;;  %v1012_v29 = vmul.bf16 %v2386_v9, %v444_v61  ;;  %v1018_v33 = vunpack.c.l.bf16 %v1010_v15  ;;  %v437_v34 = vrot.slane %v432_v10, %v2334_v8  ;;  %v1847_v7 = vld [vmem:[%s2307_s23 + $0x3c] sm:$0xf] }
  0x67   : > { %v489_v20 = vsel %vm482_vm0, %v476_v13, 0.0  ;;  %v1027_v32 = vsel %vm482_vm0, %v1017_v14, 0.0  ;;  %v369_v40 = vunpack.i.h.s16 %v2361_v43  ;;  %v478_v42 = vunpack.c.l.bf16 %v470_v18  ;;  %v304_v43 = vld [vmem:[%s2307_s23 + $0x38] sm:$0xf]  ;;  %v1855_v10 = vld [vmem:[%s2314_s13 + $0x3c] sm:$0xf] }
  0x68   : > { %490 = vadd.xlane.f32.xlu1 %v489_v20  ;;  %v486_v41 = vsel %vm482_vm0, %v475_v24, 0.0  ;;  %v471_v44 = vmul.bf16 %v451_v25, %v2394_v19  ;;  %v458_v45 = vrot.slane %v453_v35, %v2334_v8  ;;  %v1030_v48 = vsel %vm482_vm0, %v1018_v33, 0.0  ;;  %s1705_s23 = sshll.u32 %s284_s30, 4  ;;  %s1706_s23 = int_to_ptr.vmem [resolvable:$true] %s1705_s23 }
  0x69   : > { %v377_v46 = vpack.i.b16 %v369_v40, %v369_v40  ;;  %v1020_v49 = vunpack.c.l.bf16 %v1012_v29  ;;  %v469_v50 = vmul.bf16 %v437_v34, %v2402_v31  ;;  %v2416_v51 = vadd.bf16 %v1851_v38, %v1843_v37  ;;  %v314_v38 = vld [vmem:[%s2456_s5 + $0x1] sm:$0x1]  ;;  %s2044_s26 = scalar_lea.vmem %s1706_s23, 128  ;;  %p2051_p2 = scmp.lt.s32.totalorder %s1706_s23, %s2049_s6 }
  0x6a   : > { %1025 = vadd.xlane.f32.xlu0 %v1024_v23  ;;  %v495_v56 = vsel %vm482_vm0, %v478_v42, 0.0  ;;  %v479_v57 = vunpack.c.l.bf16 %v471_v44  ;;  %v472_v58 = vmul.bf16 %v458_v45, %v2406_v36  ;;  %v2425_v59 = vadd.bf16 %v312_v52, %v304_v43  ;;  %v315_v42 = vld [vmem:[%s2456_s5 + $0x2] sm:$0x1]  ;;  %p2045_p12 = scmp.ne.s32.totalorder %s1706_s23, %s2044_s26 }
  0x6b   : > { %v409_v53 = vrot.slane %v377_v46, %v2334_v8  ;;  %v1036_v1 = vsel %vm482_vm0, %v1020_v49, 0.0  ;;  %v477_v2 = vunpack.c.l.bf16 %v469_v50  ;;  %v1011_v4 = vmul.bf16 %v2416_v51, %v437_v34  ;;  %v316_v49 = vld [vmem:[%s2456_s5 + $0x3] sm:$0x1] }
  0x6c   : > { %1028 = vadd.xlane.f32.xlu1 %v1027_v32  ;;  %v2431_v5 = vadd.bf16 %v1853_v55, %v1845_v54  ;;  %v498_v11 = vsel %vm482_vm0, %v479_v57, 0.0  ;;  %v480_v12 = vunpack.c.l.bf16 %v472_v58  ;;  %v2437_v13 = vadd.bf16 %v1854_v63, %v1846_v62  ;;  %v317_v54 = vld [vmem:[%s2456_s5 + $0x4] sm:$0x1]  ;;  %v318_v63 = vld [vmem:[%s2456_s5 + $0x5] sm:$0x1]  ;;  %p2046_p10 = pnand %p2045_p12, %p3022_p7 }
  0x6d   : > { %v460_v61 = vpack.i.b16 %v409_v53, %v409_v53  ;;  %v492_v15 = vsel %vm482_vm0, %v477_v2, 0.0  ;;  %v1019_v16 = vunpack.c.l.bf16 %v1011_v4  ;;  %v2442_v18 = vadd.bf16 %v1855_v10, %v1847_v7  ;;  %v987_v10 = vld [vmem:[%s2456_s5 + $0x3] sm:$0x1] }
  0x6e   : > { %487 = vadd.xlane.f32.xlu0 %v486_v41  ;;  %3016 = vst [vmem:[#allocation11_spill] sm:$0xff] %v2431_v5  ;;  %3017 = vst [vmem:[#allocation12_spill] sm:$0xff] %v2437_v13  ;;  %v1013_v17 = vmul.bf16 %v2431_v5, %v451_v25  ;;  %v501_v20 = vsel %vm482_vm0, %v480_v12, 0.0  ;;  %v1014_v24 = vmul.bf16 %v2437_v13, %v458_v45  ;;  %v322_v40 = vunpack.c.l.bf16 %v314_v38  ;;  %v313_v41 = vld [vmem:[%s2456_s5] sm:$0x1]  ;;  %p2047_p0 = pneg %p2046_p10 }
  0x6f   : > { %v465_v6 = vrot.slane %v460_v61, %v2334_v8  ;;  %3018 = vst [vmem:[#allocation13_spill] sm:$0xff] %v2442_v18  ;;  %v1033_v26 = vsel %vm482_vm0, %v1019_v16, 0.0  ;;  %v321_v44 = vunpack.c.l.bf16 %v313_v41  ;;  %v323_v46 = vunpack.c.l.bf16 %v315_v42 }
  0x70   : > { %1031 = vadd.xlane.f32.xlu1 %v1030_v48  ;;  %v1021_v27 = vunpack.c.l.bf16 %v1013_v17  ;;  %v1022_v33 = vunpack.c.l.bf16 %v1014_v24  ;;  %v656_v45 = vrot.slane %v322_v40, %v2334_v8  ;;  %v984_v48 = vld [vmem:[%s2456_s5] sm:$0x1]  ;;  %v324_v53 = vunpack.c.l.bf16 %v316_v49 }
  0x71   : > { %v473_v14 = vmul.bf16 %v465_v6, %v2425_v59  ;;  %v1015_v29 = vmul.bf16 %v2442_v18, %v465_v6  ;;  %v652_v50 = vrot.slane %v321_v44, %v2334_v8  ;;  %v992_v43 = vunpack.c.l.bf16 %v984_v48 }
  0x72   : > { %496 = vadd.xlane.f32.xlu0 %v495_v56  ;;  %v1039_v25 = vsel %vm482_vm0, %v1021_v27, 0.0  ;;  %v1042_v35 = vsel %vm482_vm0, %v1022_v33, 0.0  ;;  %v660_v52 = vrot.slane %v323_v46, %v2334_v8  ;;  %v2468_v55 = vsub.s32 1, %v2323_v3  ;;  %v985_v56 = vld [vmem:[%s2456_s5 + $0x1] sm:$0x1] }
  0x73   : > { %v481_v23 = vunpack.c.l.bf16 %v473_v14  ;;  %v1023_v34 = vunpack.c.l.bf16 %v1015_v29  ;;  %v325_v58 = vunpack.c.l.bf16 %v317_v54  ;;  %v664_v61 = vrot.slane %v324_v53, %v2334_v8 }
  0x74   : > { %1037 = vadd.xlane.f32.xlu1 %v1036_v1  ;;  %v1183_v57 = vrot.slane %v992_v43, %v2468_v55  ;;  %v993_v62 = vunpack.c.l.bf16 %v985_v56  ;;  %v986_v1 = vld [vmem:[%s2456_s5 + $0x2] sm:$0x1]  ;;  %v326_v4 = vunpack.c.l.bf16 %v318_v63  ;;  %v995_v14 = vunpack.c.l.bf16 %v987_v10 }
  0x75   : > { %v504_v32 = vsel %vm482_vm0, %v481_v23, 0.0  ;;  %v1045_v37 = vsel %vm482_vm0, %v1023_v34, 0.0  ;;  %v668_v2 = vrot.slane %v325_v58, %v2334_v8  ;;  %v994_v7 = vunpack.c.l.bf16 %v986_v1 }
  0x76   : > { %499 = vadd.xlane.f32.xlu0 %v498_v11  ;;  %v1187_v6 = vrot.slane %v993_v62, %v2468_v55  ;;  %v672_v11 = vrot.slane %v326_v4, %v2334_v8  ;;  %v1195_v16 = vrot.slane %v995_v14, %v2468_v55  ;;  %vm572_vm8 = vcmask 64512  }
  0x77   : > { %v1191_v12 = vrot.slane %v994_v7, %v2468_v55  ;;  %v2622_v13 = vsub.s32 5, %v2323_v3  ;;  %vm1682_vm9 = vcmask 523264   ;;  %vm1684_vm10 = vcmask 588800  }
  0x78   : > { %493 = vadd.xlane.f32.xlu1 %v492_v15  ;;  %v988_v15 = vld [vmem:[%s2456_s5 + $0x4] sm:$0x1]  ;;  %vm1686_vm11 = vcmask 654336   ;;  %vm1688_vm12 = vcmask 662528  }
  0x79   : > { %v996_v17 = vunpack.c.l.bf16 %v988_v15 }
  0x7a   : > { %502 = vadd.xlane.f32.xlu0 %v501_v20 }
  0x7b   : > { %v1199_v20 = vrot.slane %v996_v17, %v2468_v55 }
  0x7c   : > { %1034 = vadd.xlane.f32.xlu1 %v1033_v26 }
  0x7e   : > { %505 = vadd.xlane.f32.xlu0 %v504_v32  ;;  %v2484_v32 = vand.u32 127, %v341_v0 }
  0x80   : > { %1040 = vadd.xlane.f32.xlu1 %v1039_v25 }
  0x82   : > { %1043 = vadd.xlane.f32.xlu0 %v1042_v35  ;;  %v2490_v35 = vsub.s32 %v2484_v32, %v2323_v3 }
  0x84   : > { %1046 = vadd.xlane.f32.xlu1 %v1045_v37 }
  0x95   : > { %685 = vbcast.lane.b32.xlu1 %v656_v45, 256 }
  0x98   : > { %682 = vbcast.lane.b32.xlu0 %v652_v50, 256 }
  0x99   : > { %688 = vbcast.lane.b32.xlu1 %v660_v52, 256 }
  0x9c   : > { %1213 = vbcast.lane.b32.xlu0 %v1183_v57, 256 }
  0x9d   : > { %691 = vbcast.lane.b32.xlu1 %v664_v61, 256 }
  0xa0   : > { %694 = vbcast.lane.b32.xlu0 %v668_v2, 256 }
  0xa1   : > { %1216 = vbcast.lane.b32.xlu1 %v1187_v6, 256 }
  0xa4   : > { %697 = vbcast.lane.b32.xlu0 %v672_v11, 256 }
  0xa5   : > { %1219 = vbcast.lane.b32.xlu1 %v1191_v12, 256 }
  0xa9   : > { %1222 = vbcast.lane.b32.xlu1 %v1195_v16, 256 }
  0xad   : > { %1225 = vbcast.lane.b32.xlu1 %v1199_v20, 256 }
  0xef   : > { %v485_v23 = vpop.xlane.xlu0 %484 }
  0xf0   : > { %v2492_v37 = vmul.f32 0.17677669, %v485_v23 }
  0xf1   : > { %v491_v24 = vpop.xlane.xlu1 %490 }
  0xf2   : > { %v2496_v41 = vmul.f32 0.17677669, %v491_v24  ;;  %v528_v0 = vrot.slane %v2492_v37, %v2490_v35 }
  0xf3   : > { %v1026_v26 = vpop.xlane.xlu0 %1025 }
  0xf4   : > { %v2506_v49 = vmul.f32 0.17677669, %v1026_v26  ;;  %v536_v53 = vrot.slane %v2496_v41, %v2490_v35 }
  0xf5   : > { %v1029_v27 = vpop.xlane.xlu1 %1028 }
  0xf6   : > { %v2500_v44 = vmul.f32 0.17677669, %v1029_v27  ;;  %v1067_v2 = vrot.slane %v2506_v49, %v2490_v35 }
  0xf7   : > { %v488_v29 = vpop.xlane.xlu0 %487 }
  0xf8   : > { %v2486_v25 = vmul.f32 0.17677669, %v488_v29  ;;  %v1071_v56 = vrot.slane %v2500_v44, %v2490_v35 }
  0xf9   : > { %v1032_v33 = vpop.xlane.xlu1 %1031 }
  0xfa   : > { %v532_v40 = vrot.slane %v2486_v25, %v2490_v35  ;;  %v2502_v45 = vmul.f32 0.17677669, %v1032_v33  ;;  %v1096_v15 = vsel %vm557_vm1, %v1071_v56, %v1067_v2  ;;  %v319_v2 = vld [vmem:[%s2456_s5 + $0x6] sm:$0x1] }
  0xfb   : > { %v497_v34 = vpop.xlane.xlu0 %496 }
  0xfc   : > { %v2504_v46 = vmul.f32 0.17677669, %v497_v34  ;;  %v558_v50 = vsel %vm557_vm1, %v532_v40, %v528_v0  ;;  %v1075_v61 = vrot.slane %v2502_v45, %v2490_v35 }
  0xfd   : > { %v1038_v38 = vpop.xlane.xlu1 %1037  ;;  %v560_v63 = vsel %vm559_vm2, %v536_v53, %v558_v50 }
  0xfe   : > { %v544_v62 = vrot.slane %v2504_v46, %v2490_v35  ;;  %v2533_v10 = vmul.f32 0.17677669, %v1038_v38  ;;  %v1097_v23 = vsel %vm559_vm2, %v1075_v61, %v1096_v15 }
  0xff   : > { %v500_v42 = vpop.xlane.xlu0 %499 }
 0x100   : > { %v2509_v43 = vmul.f32 0.17677669, %v500_v42  ;;  %v1083_v33 = vrot.slane %v2533_v10, %v2490_v35 }
 0x101   : > { %v494_v48 = vpop.xlane.xlu1 %493 }
 0x102   : > { %v2511_v52 = vmul.f32 0.17677669, %v494_v48  ;;  %v548_v4 = vrot.slane %v2509_v43, %v2490_v35 }
 0x103   : > { %v503_v54 = vpop.xlane.xlu0 %502 }
 0x104   : > { %v540_v57 = vrot.slane %v2511_v52, %v2490_v35  ;;  %v2519_v58 = vmul.f32 0.17677669, %v503_v54 }
 0x105   : > { %v1035_v1 = vpop.xlane.xlu1 %1034 }
 0x106   : > { %v562_v6 = vsel %vm561_vm3, %v540_v57, %v560_v63  ;;  %v2531_v7 = vmul.f32 0.17677669, %v1035_v1  ;;  %v552_v11 = vrot.slane %v2519_v58, %v2490_v35 }
 0x107   : > { %v506_v12 = vpop.xlane.xlu0 %505  ;;  %v564_v14 = vsel %vm563_vm4, %v544_v62, %v562_v6  ;;  %v327_v6 = vunpack.c.l.bf16 %v319_v2  ;;  %v2604_v2 = vsub.s32 3, %v2323_v3 }
 0x108   : > { %v1079_v16 = vrot.slane %v2531_v7, %v2490_v35  ;;  %v2541_v17 = vmul.f32 0.17677669, %v506_v12  ;;  %v566_v20 = vsel %vm565_vm5, %v548_v4, %v564_v14  ;;  %v989_v4 = vld [vmem:[%s2456_s5 + $0x5] sm:$0x1]  ;;  %v991_v14 = vld [vmem:[%s2456_s5 + $0x7] sm:$0x1] }
 0x109   : > { %v1041_v24 = vpop.xlane.xlu1 %1040  ;;  %v568_v38 = vsel %vm567_vm6, %v552_v11, %v566_v20  ;;  %v320_v11 = vld [vmem:[%s2456_s5 + $0x7] sm:$0x1]  ;;  %v997_v12 = vunpack.c.l.bf16 %v989_v4  ;;  %v676_v15 = vrot.slane %v327_v6, %v2334_v8 }
 0x10a   : > { %v1098_v26 = vsel %vm561_vm3, %v1079_v16, %v1097_v23  ;;  %v556_v27 = vrot.slane %v2541_v17, %v2490_v35  ;;  %v2548_v29 = vmul.f32 0.17677669, %v1041_v24  ;;  %v328_v16 = vunpack.c.l.bf16 %v320_v11  ;;  %v990_v23 = vld [vmem:[%s2456_s5 + $0x6] sm:$0x1] }
 0x10b   : > { %v1044_v34 = vpop.xlane.xlu0 %1043  ;;  %v1099_v53 = vsel %vm563_vm4, %v1083_v33, %v1098_v26  ;;  %v1203_v20 = vrot.slane %v997_v12, %v2468_v55  ;;  %v999_v24 = vunpack.c.l.bf16 %v991_v14 }
 0x10c   : > { %v1087_v40 = vrot.slane %v2548_v29, %v2490_v35  ;;  %v2555_v42 = vmul.f32 0.17677669, %v1044_v34  ;;  %v570_v0 = vsel %vm569_vm7, %v556_v27, %v568_v38  ;;  %v680_v26 = vrot.slane %v328_v16, %v2334_v8 }
 0x10d   : > { %v1047_v48 = vpop.xlane.xlu1 %1046  ;;  %v573_v50 = vsel %vm572_vm8, %v570_v0, -inf  ;;  %v998_v27 = vunpack.c.l.bf16 %v990_v23  ;;  %v1211_v33 = vrot.slane %v999_v24, %v2468_v55  ;;  %v2119_v38 = vmov 0  }
 0x10e   : > { %v1091_v54 = vrot.slane %v2555_v42, %v2490_v35  ;;  %v2562_v56 = vmul.f32 0.17677669, %v1047_v48  ;;  %574 = vmax.xlane.f32.xlu0 %v573_v50  ;;  %v1100_v57 = vsel %vm565_vm5, %v1087_v40, %v1099_v53  ;;  %1921 = vset.pattern.permute.xlu1 %v2119_v38  ;;  %v2615_v23 = vsub.s32 4, %v2323_v3 }
 0x10f   : > { %v1207_v34 = vrot.slane %v998_v27, %v2468_v55  ;;  %1920 = vset.pattern.permute.xlu0 %v2119_v38  ;;  %v2586_v50 = vpop.permute.xlu0 %682 }
 0x110   : > { %v1095_v61 = vrot.slane %v2562_v56, %v2490_v35  ;;  %v1101_v62 = vsel %vm567_vm6, %v1091_v54, %v1100_v57 }
 0x111   : > { %v2580_v40 = vpop.permute.xlu1 %685 }
 0x112   : > { %v1102_v63 = vsel %vm569_vm7, %v1095_v61, %v1101_v62 }
 0x113   : > { %v1104_v1 = vsel %vm572_vm8, %v1102_v63, -inf  ;;  %v2590_v54 = vpop.permute.xlu0 %1213 }
 0x114   : > { %1105 = vmax.xlane.f32.xlu1 %v1104_v1  ;;  %v2601_v1 = vsub.s32 2, %v2323_v3 }
 0x115   : > { %v2582_v0 = vpop.permute.xlu1 %688 }
 0x117   : > { %v2594_v61 = vpop.permute.xlu0 %694 }
 0x119   : > { %v2584_v48 = vpop.permute.xlu1 %691 }
 0x11b   : > { %v2598_v63 = vpop.permute.xlu0 %697 }
 0x11d   : > { %v2588_v53 = vpop.permute.xlu1 %1216 }
 0x121   : > { %v2592_v57 = vpop.permute.xlu1 %1219 }
 0x124   : > { %700 = vbcast.lane.b32.xlu0 %v676_v15, 256 }
 0x125   : > { %1228 = vbcast.lane.b32.xlu1 %v1203_v20, 256  ;;  %v2596_v62 = vpop.permute.xlu1 %1222 }
 0x128   : > { %703 = vbcast.lane.b32.xlu0 %v680_v26, 256 }
 0x129   : > { %1234 = vbcast.lane.b32.xlu1 %v1211_v33, 256  ;;  %v2610_v15 = vpop.permute.xlu1 %1225 }
 0x12c   : > { %1231 = vbcast.lane.b32.xlu0 %v1207_v34, 256 }
 0x197   : > { %v575_v4 = vpop.xlane.xlu0 %574 }
 0x198   : > { %v580_v6 = vrot.slane %v575_v4, %v2334_v8  ;;  %v584_v11 = vrot.slane %v575_v4, %v2468_v55  ;;  %v588_v12 = vrot.slane %v575_v4, %v2601_v1  ;;  %v592_v14 = vrot.slane %v575_v4, %v2604_v2 }
 0x19a   : > { %v618_v16 = vsub.f32 %v2486_v25, %v584_v11  ;;  %v617_v20 = vsub.f32 %v2492_v37, %v580_v6  ;;  %v619_v24 = vsub.f32 %v2496_v41, %v588_v12  ;;  %v620_v26 = vsub.f32 %v2511_v52, %v592_v14 }
 0x19b   : > { %v596_v25 = vrot.slane %v575_v4, %v2615_v23  ;;  %v2629_v12 = vsub.s32 6, %v2323_v3  ;;  %v600_v14 = vrot.slane %v575_v4, %v2622_v13 }
 0x19c   : > { %v627_v33 = vmul.f32 1.442695, %v618_v16  ;;  %v625_v18 = vmul.f32 1.442695, %v617_v20  ;;  %v629_v37 = vmul.f32 1.442695, %v619_v24 }
 0x19d   : > { %v1106_v27 = vpop.xlane.xlu1 %1105  ;;  %v631_v11 = vmul.f32 1.442695, %v620_v26  ;;  %v621_v16 = vsub.f32 %v2504_v46, %v596_v25 }
 0x19e   : > { %v1111_v34 = vrot.slane %v1106_v27, %v2334_v8  ;;  %v1115_v38 = vrot.slane %v1106_v27, %v2468_v55  ;;  %v1119_v6 = vrot.slane %v1106_v27, %v2601_v1  ;;  %1922 = vpow2.f32 %v627_v33 }
 0x19f   : > { %1924 = vpow2.f32 %v625_v18  ;;  %v1123_v20 = vrot.slane %v1106_v27, %v2604_v2  ;;  %v633_v33 = vmul.f32 1.442695, %v621_v16  ;;  %v622_v18 = vsub.f32 %v2509_v43, %v600_v14 }
 0x1a0   : > { %v1148_v41 = vsub.f32 %v2506_v49, %v1111_v34  ;;  %v1149_v52 = vsub.f32 %v2500_v44, %v1115_v38  ;;  %1926 = vpow2.f32 %v629_v37  ;;  %v1150_v26 = vsub.f32 %v2502_v45, %v1119_v6 }
 0x1a1   : > { %1928 = vpow2.f32 %v631_v11  ;;  %v604_v49 = vrot.slane %v575_v4, %v2629_v12  ;;  %v2637_v44 = vsub.s32 7, %v2323_v3  ;;  %v1127_v34 = vrot.slane %v1106_v27, %v2615_v23 }
 0x1a2   : > { %v1156_v24 = vmul.f32 1.442695, %v1148_v41  ;;  %v1158_v5 = vmul.f32 1.442695, %v1149_v52  ;;  %v1160_v38 = vmul.f32 1.442695, %v1150_v26  ;;  %v1151_v46 = vsub.f32 %v2531_v7, %v1123_v20 }
 0x1a3   : > { %v623_v25 = vsub.f32 %v2519_v58, %v604_v49  ;;  %v608_v45 = vrot.slane %v575_v4, %v2637_v44  ;;  %v635_v37 = vmul.f32 1.442695, %v622_v18  ;;  %v1131_v6 = vrot.slane %v1106_v27, %v2622_v13 }
 0x1a4   : > { %1930 = vpow2.f32 %v1156_v24  ;;  %v1162_v11 = vmul.f32 1.442695, %v1151_v46  ;;  %v1152_v41 = vsub.f32 %v2533_v10, %v1127_v34  ;;  %v1135_v58 = vrot.slane %v1106_v27, %v2629_v12 }
 0x1a5   : > { %1932 = vpow2.f32 %v1158_v5  ;;  %v637_v52 = vmul.f32 1.442695, %v623_v25  ;;  %v624_v14 = vsub.f32 %v2541_v17, %v608_v45  ;;  %v1139_v5 = vrot.slane %v1106_v27, %v2637_v44 }
 0x1a6   : > { %1934 = vpow2.f32 %v633_v33  ;;  %v1153_v20 = vsub.f32 %v2548_v29, %v1131_v6  ;;  %v1164_v10 = vmul.f32 1.442695, %v1152_v41  ;;  %v1229_v41 = vpop.permute.xlu1 %1228 }
 0x1a7   : > { %1936 = vpow2.f32 %v1160_v38  ;;  %v639_v17 = vmul.f32 1.442695, %v624_v14  ;;  %v1155_v29 = vsub.f32 %v2562_v56, %v1139_v5 }
 0x1a8   : > { %1938 = vpow2.f32 %v635_v37  ;;  %v1166_v49 = vmul.f32 1.442695, %v1153_v20  ;;  %v701_v37 = vpop.permute.xlu0 %700 }
 0x1a9   : > { %1940 = vpow2.f32 %v1162_v11  ;;  %v1170_v38 = vmul.f32 1.442695, %v1155_v29 }
 0x1aa   : > { %1942 = vpow2.f32 %v637_v52  ;;  %v1235_v20 = vpop.permute.xlu1 %1234 }
 0x1ab   : > { %v1923_v43 = vpop.eup %1922  ;;  %1944 = vpow2.f32 %v1164_v10 }
 0x1ac   : > { %v1925_v16 = vpop.eup %1924  ;;  %v2648_v7 = vmul.f32 %v1923_v43, %v2580_v40  ;;  %v1154_v40 = vsub.f32 %v2555_v42, %v1135_v58  ;;  %1946 = vpow2.f32 %v639_v17  ;;  %v704_v52 = vpop.permute.xlu0 %703 }
 0x1ad   : > { %v1927_v4 = vpop.eup %1926  ;;  %v2654_v24 = vmul.f32 %v1925_v16, %v2586_v50  ;;  %1948 = vpow2.f32 %v1166_v49 }
 0x1ae   : > { %v1929_v26 = vpop.eup %1928  ;;  %733 = vperm.xlu1 %1921, %v2648_v7   ;;  %v2660_v27 = vmul.f32 %v1927_v4, %v2582_v0  ;;  %v1168_v34 = vmul.f32 1.442695, %v1154_v40 }
 0x1af   : > { %730 = vperm.xlu0 %1920, %v2654_v24   ;;  %v2664_v50 = vmul.f32 %v1929_v26, %v2584_v48 }
 0x1b0   : > { %1950 = vpow2.f32 %v1168_v34  ;;  %v1232_v58 = vpop.permute.xlu0 %1231 }
 0x1b1   : > { %v1931_v33 = vpop.eup %1930  ;;  %1952 = vpow2.f32 %v1170_v38 }
 0x1b2   : > { %736 = vperm.xlu1 %1921, %v2660_v27   ;;  %v1933_v18 = vpop.eup %1932  ;;  %v2669_v42 = vmul.f32 %v1931_v33, %v2590_v54 }
 0x1b3   : > { %739 = vperm.xlu0 %1920, %v2664_v50   ;;  %v1935_v0 = vpop.eup %1934  ;;  %v2672_v56 = vmul.f32 %v1933_v18, %v2588_v53 }
 0x1b4   : > { %v1937_v48 = vpop.eup %1936  ;;  %v2677_v46 = vmul.f32 %v1935_v0, %v2594_v61 }
 0x1b5   : > { %v1939_v25 = vpop.eup %1938  ;;  %v2680_v54 = vmul.f32 %v1937_v48, %v2592_v57 }
 0x1b6   : > { %1261 = vperm.xlu1 %1921, %v2669_v42   ;;  %v1941_v45 = vpop.eup %1940  ;;  %v2685_v53 = vmul.f32 %v1939_v25, %v2598_v63 }
 0x1b7   : > { %1264 = vperm.xlu0 %1920, %v2672_v56   ;;  %v1943_v6 = vpop.eup %1942  ;;  %v2688_v11 = vmul.f32 %v1941_v45, %v2596_v62 }
 0x1b8   : > { %v1945_v61 = vpop.eup %1944  ;;  %v2692_v57 = vmul.f32 %v1943_v6, %v701_v37 }
 0x1b9   : > { %v1947_v43 = vpop.eup %1946  ;;  %v2695_v14 = vmul.f32 %v1945_v61, %v2610_v15 }
 0x1ba   : > { %742 = vperm.xlu1 %1921, %v2677_v46   ;;  %v1949_v16 = vpop.eup %1948  ;;  %v2699_v62 = vmul.f32 %v1947_v43, %v704_v52 }
 0x1bb   : > { %1267 = vperm.xlu0 %1920, %v2680_v54   ;;  %v2701_v5 = vmul.f32 %v1949_v16, %v1229_v41 }
 0x1bd   : > { %v1951_v63 = vpop.eup %1950 }
 0x1be   : > { %745 = vperm.xlu1 %1921, %v2685_v53   ;;  %v1953_v4 = vpop.eup %1952  ;;  %v2705_v10 = vmul.f32 %v1951_v63, %v1232_v58 }
 0x1bf   : > { %1270 = vperm.xlu0 %1920, %v2688_v11   ;;  %v2707_v15 = vmul.f32 %v1953_v4, %v1235_v20 }
 0x1c2   : > { %748 = vperm.xlu1 %1921, %v2692_v57  }
 0x1c3   : > { %1273 = vperm.xlu0 %1920, %v2695_v14  }
 0x1c6   : > { %751 = vperm.xlu1 %1921, %v2699_v62  }
 0x1c7   : > { %1276 = vperm.xlu0 %1920, %v2701_v5  }
 0x1ca   : > { %1279 = vperm.xlu1 %1921, %v2705_v10  }
 0x1cb   : > { %1282 = vperm.xlu0 %1920, %v2707_v15  }
 0x229   : > { %v734_v26 = vpop.permute.xlu1 %733 }
 0x22a   : > { %v731_v17 = vpop.permute.xlu0 %730  ;;  %v760_v0 = vrot.slane %v734_v26, %v2490_v35 }
 0x22b   : > { %v756_v38 = vrot.slane %v731_v17, %v2490_v35 }
 0x22d   : > { %v737_v40 = vpop.permute.xlu1 %736  ;;  %v785_v37 = vsel %vm557_vm1, %v760_v0, %v756_v38 }
 0x22e   : > { %v740_v49 = vpop.permute.xlu0 %739  ;;  %v764_v48 = vrot.slane %v737_v40, %v2490_v35 }
 0x22f   : > { %v768_v6 = vrot.slane %v740_v49, %v2490_v35 }
 0x230   : > { %v786_v61 = vsel %vm559_vm2, %v764_v48, %v785_v37 }
 0x231   : > { %v1262_v29 = vpop.permute.xlu1 %1261  ;;  %v787_v20 = vsel %vm561_vm3, %v768_v6, %v786_v61 }
 0x232   : > { %v1265_v33 = vpop.permute.xlu0 %1264  ;;  %v1287_v63 = vrot.slane %v1262_v29, %v2490_v35 }
 0x233   : > { %v1291_v58 = vrot.slane %v1265_v33, %v2490_v35 }
 0x235   : > { %v743_v18 = vpop.permute.xlu1 %742  ;;  %v1316_v33 = vsel %vm557_vm1, %v1291_v58, %v1287_v63 }
 0x236   : > { %v1268_v34 = vpop.permute.xlu0 %1267  ;;  %v772_v41 = vrot.slane %v743_v18, %v2490_v35 }
 0x237   : > { %v1295_v26 = vrot.slane %v1268_v34, %v2490_v35 }
 0x238   : > { %v788_v17 = vsel %vm563_vm4, %v772_v41, %v787_v20 }
 0x239   : > { %v746_v25 = vpop.permute.xlu1 %745  ;;  %v1317_v34 = vsel %vm559_vm2, %v1295_v26, %v1316_v33 }
 0x23a   : > { %v1271_v45 = vpop.permute.xlu0 %1270  ;;  %v776_v52 = vrot.slane %v746_v25, %v2490_v35 }
 0x23b   : > { %v1299_v40 = vrot.slane %v1271_v45, %v2490_v35 }
 0x23c   : > { %v789_v18 = vsel %vm565_vm5, %v776_v52, %v788_v17 }
 0x23d   : > { %v749_v43 = vpop.permute.xlu1 %748  ;;  %v1318_v45 = vsel %vm561_vm3, %v1299_v40, %v1317_v34 }
 0x23e   : > { %v1274_v16 = vpop.permute.xlu0 %1273  ;;  %v780_v4 = vrot.slane %v749_v43, %v2490_v35 }
 0x23f   : > { %v1303_v0 = vrot.slane %v1274_v16, %v2490_v35 }
 0x240   : > { %v790_v25 = vsel %vm567_vm6, %v780_v4, %v789_v18 }
 0x241   : > { %v752_v49 = vpop.permute.xlu1 %751  ;;  %v1319_v41 = vsel %vm563_vm4, %v1303_v0, %v1318_v45 }
 0x242   : > { %v784_v38 = vrot.slane %v752_v49, %v2490_v35  ;;  %v1277_v29 = vpop.permute.xlu0 %1276 }
 0x243   : > { %v1307_v48 = vrot.slane %v1277_v29, %v2490_v35 }
 0x244   : > { %v791_v37 = vsel %vm569_vm7, %v784_v38, %v790_v25 }
 0x245   : > { %v1280_v6 = vpop.permute.xlu1 %1279  ;;  %v793_v61 = vsel %vm572_vm8, %v791_v37, 0.0  ;;  %v1320_v16 = vsel %vm565_vm5, %v1307_v48, %v1319_v41 }
 0x246   : > { %v1311_v43 = vrot.slane %v1280_v6, %v2490_v35  ;;  %v1283_v52 = vpop.permute.xlu0 %1282  ;;  %794 = vadd.xlane.f32.xlu1 %v793_v61 }
 0x247   : > { %v1315_v63 = vrot.slane %v1283_v52, %v2490_v35 }
 0x248   : > { %v1321_v58 = vsel %vm567_vm6, %v1311_v43, %v1320_v16 }
 0x249   : > { %v1322_v4 = vsel %vm569_vm7, %v1315_v63, %v1321_v58 }
 0x24a   : > { %v1324_v20 = vsel %vm572_vm8, %v1322_v4, 0.0 }
 0x24b   : > { %1325 = vadd.xlane.f32.xlu0 %v1324_v20 }
 0x2cf   : > { %v795_v26 = vpop.xlane.xlu1 %794 }
 0x2d0   : > { %v796_v17 = vadd.f32 1e-12, %v795_v26 }
 0x2d2   : > { %v809_v40 = vrot.slane %v796_v17, %v2601_v1  ;;  %v805_v49 = vrot.slane %v796_v17, %v2468_v55  ;;  %v801_v18 = vrot.slane %v796_v17, %v2334_v8  ;;  %v813_v0 = vrot.slane %v796_v17, %v2604_v2 }
 0x2d3   : > { %v817_v29 = vrot.slane %v796_v17, %v2615_v23  ;;  %v821_v25 = vrot.slane %v796_v17, %v2622_v13  ;;  %v825_v41 = vrot.slane %v796_v17, %v2629_v12 }
 0x2d4   : > { %v1326_v38 = vpop.xlane.xlu0 %1325  ;;  %1954 = vrcp.f32 %v809_v40 }
 0x2d5   : > { %v1327_v35 = vadd.f32 1e-12, %v1326_v38  ;;  %1956 = vrcp.f32 %v805_v49 }
 0x2d6   : > { %1958 = vrcp.f32 %v801_v18 }
 0x2d7   : > { %1960 = vrcp.f32 %v813_v0  ;;  %v1336_v33 = vrot.slane %v1327_v35, %v2468_v55  ;;  %v1340_v48 = vrot.slane %v1327_v35, %v2601_v1  ;;  %v1332_v34 = vrot.slane %v1327_v35, %v2334_v8 }
 0x2d8   : > { %v1344_v37 = vrot.slane %v1327_v35, %v2604_v2  ;;  %v1348_v1 = vrot.slane %v1327_v35, %v2615_v23  ;;  %v829_v2 = vrot.slane %v796_v17, %v2637_v44  ;;  %v1352_v63 = vrot.slane %v1327_v35, %v2622_v13 }
 0x2d9   : > { %1962 = vrcp.f32 %v1336_v33  ;;  %v1356_v23 = vrot.slane %v1327_v35, %v2629_v12  ;;  %v1360_v20 = vrot.slane %v1327_v35, %v2637_v44 }
 0x2da   : > { %1964 = vrcp.f32 %v817_v29 }
 0x2db   : > { %1966 = vrcp.f32 %v1340_v48  ;;  %v1599_v48 = vadd.s32 4294967232, %v2484_v32 }
 0x2dc   : > { %1968 = vrcp.f32 %v821_v25 }
 0x2dd   : > { %1970 = vrcp.f32 %v1332_v34 }
 0x2de   : > { %1972 = vrcp.f32 %v1344_v37 }
 0x2df   : > { %1974 = vrcp.f32 %v825_v41 }
 0x2e0   : > { %1976 = vrcp.f32 %v1348_v1  ;;  %v1387_v1 = vunpack.c.l.bf16 %v2364_v47  ;;  %v1385_v47 = vunpack.c.l.bf16 %v2350_v28 }
 0x2e1   : > { %v1955_v45 = vpop.eup %1954  ;;  %1978 = vrcp.f32 %v829_v2 }
 0x2e2   : > { %v1957_v6 = vpop.eup %1956  ;;  %v843_v61 = vmul.f32 %v1955_v45, %v2660_v27  ;;  %1980 = vrcp.f32 %v1352_v63 }
 0x2e3   : > { %v1959_v55 = vpop.eup %1958  ;;  %v841_v43 = vmul.f32 %v1957_v6, %v2648_v7  ;;  %1982 = vrcp.f32 %v1356_v23  ;;  %v854_v6 = vunpack.c.l.bf16 %v2343_v21 }
 0x2e4   : > { %v1961_v52 = vpop.eup %1960  ;;  %874 = vperm.xlu1 %1921, %v843_v61   ;;  %v839_v8 = vmul.f32 %v1959_v55, %v2654_v24  ;;  %1984 = vrcp.f32 %v1360_v20 }
 0x2e5   : > { %869 = vperm.xlu0 %1920, %v841_v43   ;;  %v845_v27 = vmul.f32 %v1961_v52, %v2664_v50  ;;  %v858_v43 = vunpack.c.l.bf16 %v2378_v60 }
 0x2e6   : > { %v1963_v16 = vpop.eup %1962 }
 0x2e7   : > { %v1965_v58 = vpop.eup %1964  ;;  %v1372_v7 = vmul.f32 %v1963_v16, %v2672_v56 }
 0x2e8   : > { %864 = vperm.xlu1 %1921, %v839_v8   ;;  %v1967_v4 = vpop.eup %1966  ;;  %v847_v24 = vmul.f32 %v1965_v58, %v2677_v46 }
 0x2e9   : > { %879 = vperm.xlu0 %1920, %v845_v27   ;;  %v1969_v26 = vpop.eup %1968  ;;  %v1374_v50 = vmul.f32 %v1967_v4, %v2680_v54 }
 0x2ea   : > { %v1971_v13 = vpop.eup %1970  ;;  %v849_v17 = vmul.f32 %v1969_v26, %v2685_v53 }
 0x2eb   : > { %v1973_v56 = vpop.eup %1972  ;;  %v1370_v12 = vmul.f32 %v1971_v13, %v2669_v42 }
 0x2ec   : > { %1400 = vperm.xlu1 %1921, %v1372_v7   ;;  %v1975_v40 = vpop.eup %1974  ;;  %v1376_v46 = vmul.f32 %v1973_v56, %v2688_v11 }
 0x2ed   : > { %884 = vperm.xlu0 %1920, %v847_v24   ;;  %v1977_v49 = vpop.eup %1976  ;;  %v851_v44 = vmul.f32 %v1975_v40, %v2692_v57  ;;  %v1986_v57 = vld [vmem:[%s2328_s9] sm:$0xf]  ;;  %s2050_s9 = scalar_lea.vmem %s2049_s6, 256 }
 0x2ee   : > { %v1979_v54 = vpop.eup %1978  ;;  %v1378_v18 = vmul.f32 %v1977_v49, %v2695_v14  ;;  %v2776_v33 = vunpack.c.l.bf16 %v1986_v57  ;;  %v856_v14 = vunpack.c.l.bf16 %v2345_v22  ;;  %v857_v22 = vunpack.c.l.bf16 %v2402_v31  ;;  %p2052_p4 = scmp.lt.s32.totalorder %s2050_s9, %s2044_s26 }
 0x2ef   : > { %v1981_v0 = vpop.eup %1980  ;;  %v853_v53 = vmul.f32 %v1979_v54, %v2699_v62  ;;  %v855_v62 = vunpack.c.l.bf16 %v2358_v39  ;;  %v1386_v39 = vunpack.c.l.bf16 %v2352_v30  ;;  %v859_v31 = vunpack.c.l.bf16 %v2394_v19 }
 0x2f0   : > { %1405 = vperm.xlu1 %1921, %v1374_v50   ;;  %v1983_v38 = vpop.eup %1982  ;;  %v1380_v42 = vmul.f32 %v1981_v0, %v2701_v5  ;;  %v1640_v5 = vadd.s32 4294967224, %v2484_v32  ;;  %v1500_v25 = vrot.slane %v2776_v33, 2  ;;  %v1499_v37 = vrot.slane %v2776_v33, 1  ;;  %p2053_p9 = por %p2052_p4, %p2051_p2 }
 0x2f1   : > { %889 = vperm.xlu0 %1920, %v849_v17   ;;  %v1985_v35 = vpop.eup %1984  ;;  %v1382_v11 = vmul.f32 %v1983_v38, %v2705_v10  ;;  %v2784_v10 = vsub.s32 %v1599_v48, %v2323_v3  ;;  %v1501_v41 = vrot.slane %v2776_v33, 3  ;;  %v1502_v2 = vrot.slane %v2776_v33, 4 }
 0x2f2   : > { %v1384_v29 = vmul.f32 %v1985_v35, %v2707_v15  ;;  %v2793_v55 = vsub.s32 %v1640_v5, %v2323_v3  ;;  %v1388_v54 = vunpack.c.l.bf16 %v2416_v51  ;;  %v1503_v5 = vrot.slane %v2776_v33, 5  ;;  %p2054_p11 = pnand %p2053_p9, %p2047_p0 }
 0x2f4   : > { %1395 = vperm.xlu1 %1921, %v1370_v12  }
 0x2f5   : > { %1410 = vperm.xlu0 %1920, %v1376_v46  }
 0x2f8   : > { %894 = vperm.xlu1 %1921, %v851_v44  }
 0x2f9   : > { %1415 = vperm.xlu0 %1920, %v1378_v18   ;;  %v860_v18 = vunpack.c.l.bf16 %v2406_v36 }
 0x2fc   : > { %899 = vperm.xlu1 %1921, %v853_v53  }
 0x2fd   : > { %1420 = vperm.xlu0 %1920, %v1380_v42  }
 0x300   : > { %1425 = vperm.xlu1 %1921, %v1382_v11  }
 0x301   : > { %1430 = vperm.xlu0 %1920, %v1384_v29  }
 0x35f   : > { %v875_v34 = vpop.permute.xlu1 %874 }
 0x360   : > { %v904_v15 = vmul.f32 %v875_v34, %v856_v14  ;;  %v870_v45 = vpop.permute.xlu0 %869  ;;  %v1611_v60 = vrot.slane %v875_v34, %v2784_v10  ;;  %v1389_v34 = vunpack.c.l.bf16 %v2386_v9 }
 0x361   : > { %v903_v61 = vmul.f32 %v870_v45, %v855_v62  ;;  %v1607_v30 = vrot.slane %v870_v45, %v2784_v10 }
 0x362   : > { %v924_v32 = vsel %vm482_vm0, %v904_v15, 0.0 }
 0x363   : > { %v925_v52 = vrot.slane %v924_v32, 4  ;;  %v917_v8 = vsel %vm482_vm0, %v903_v61, 0.0  ;;  %v865_v21 = vpop.permute.xlu1 %864 }
 0x364   : > { %v918_v16 = vrot.slane %v917_v8, 4  ;;  %v902_v27 = vmul.f32 %v865_v21, %v854_v6  ;;  %v1603_v63 = vrot.slane %v865_v21, %v2784_v10  ;;  %v880_v3 = vpop.permute.xlu0 %879 }
 0x365   : > { %v926_v58 = vadd.f32 %v925_v52, %v924_v32  ;;  %v905_v7 = vmul.f32 %v880_v3, %v857_v22  ;;  %v1615_v19 = vrot.slane %v880_v3, %v2784_v10  ;;  %v3019_v52 = vld [vmem:[#allocation11_spill] sm:$0xff] }
 0x366   : > { %v919_v23 = vadd.f32 %v918_v16, %v917_v8  ;;  %v910_v4 = vsel %vm482_vm0, %v902_v27, 0.0  ;;  %v1632_v24 = vsel %vm557_vm1, %v1607_v30, %v1603_v63  ;;  %v1390_v8 = vunpack.c.l.bf16 %v3019_v52 }
 0x367   : > { %v927_v20 = vrot.slane %v926_v58, 2  ;;  %v911_v26 = vrot.slane %v910_v4, 4  ;;  %v1633_v50 = vsel %vm559_vm2, %v1611_v60, %v1632_v24  ;;  %v931_v13 = vsel %vm482_vm0, %v905_v7, 0.0  ;;  %v2809_v17 = vpop.permute.xlu1 %1400  ;;  %v3020_v60 = vld [vmem:[#allocation12_spill] sm:$0xff] }
 0x368   : > { %v920_v56 = vrot.slane %v919_v23, 2  ;;  %v932_v12 = vrot.slane %v931_v13, 4  ;;  %v1634_v40 = vsel %vm561_vm3, %v1615_v19, %v1633_v50  ;;  %v1434_v28 = vmul.f32 %v2809_v17, %v1386_v39  ;;  %v885_v46 = vpop.permute.xlu0 %884 }
 0x369   : > { %v912_v49 = vadd.f32 %v911_v26, %v910_v4  ;;  %v906_v44 = vmul.f32 %v885_v46, %v858_v43  ;;  %v1619_v42 = vrot.slane %v885_v46, %v2784_v10  ;;  %v928_v35 = vadd.f32 %v927_v20, %v926_v58 }
 0x36a   : > { %v921_v0 = vadd.f32 %v920_v56, %v919_v23  ;;  %v933_v53 = vadd.f32 %v932_v12, %v931_v13  ;;  %v1448_v38 = vsel %vm482_vm0, %v1434_v28, 0.0  ;;  %v861_v43 = vunpack.c.l.bf16 %v2425_v59  ;;  %v3021_v23 = vld [vmem:[#allocation13_spill] sm:$0xff] }
 0x36b   : > { %v913_v11 = vrot.slane %v912_v49, 2  ;;  %v1449_v29 = vrot.slane %v1448_v38, 4  ;;  %v938_v57 = vsel %vm482_vm0, %v906_v44, 0.0  ;;  %v1406_v14 = vpop.permute.xlu1 %1405  ;;  %v1635_v62 = vsel %vm563_vm4, %v1619_v42, %v1634_v40 }
 0x36c   : > { %v939_v48 = vrot.slane %v938_v57, 4  ;;  %v922_v15 = vrot.slane %v921_v0, 1  ;;  %v1435_v61 = vmul.f32 %v1406_v14, %v1387_v1  ;;  %v890_v22 = vpop.permute.xlu0 %889  ;;  %v934_v39 = vrot.slane %v933_v53, 2 }
 0x36d   : > { %v914_v45 = vadd.f32 %v913_v11, %v912_v49  ;;  %v1450_v6 = vadd.f32 %v1449_v29, %v1448_v38  ;;  %v929_v21 = vrot.slane %v928_v35, 1  ;;  %v1391_v7 = vunpack.c.l.bf16 %v3020_v60 }
 0x36e   : > { %v940_v32 = vadd.f32 %v939_v48, %v938_v57  ;;  %v1455_v27 = vsel %vm482_vm0, %v1435_v61, 0.0  ;;  %v1392_v4 = vunpack.c.l.bf16 %v3021_v23  ;;  %v923_v1 = vadd.f32 %v922_v15, %v921_v0 }
 0x36f   : > { %v915_v16 = vrot.slane %v914_v45, 1  ;;  %v1451_v30 = vrot.slane %v1450_v6, 2  ;;  %v1396_v63 = vpop.permute.xlu1 %1395  ;;  %v1456_v58 = vrot.slane %v1455_v27, 4  ;;  %v907_v19 = vmul.f32 %v890_v22, %v859_v31 }
 0x370   : > { %v941_v3 = vrot.slane %v940_v32, 2  ;;  %v1623_v20 = vrot.slane %v890_v22, %v2784_v10  ;;  %v935_v26 = vadd.f32 %v934_v39, %v933_v53  ;;  %v1433_v56 = vmul.f32 %v1396_v63, %v1385_v47  ;;  %v1411_v49 = vpop.permute.xlu0 %1410 }
 0x371   : > { %v916_v24 = vadd.f32 %v915_v16, %v914_v45  ;;  %v1452_v50 = vadd.f32 %v1451_v30, %v1450_v6  ;;  %v1457_v13 = vadd.f32 %v1456_v58, %v1455_v27  ;;  %v2827_v12 = vadd.f32 %v929_v21, %v928_v35 }
 0x372   : > { %v942_v28 = vadd.f32 %v941_v3, %v940_v32  ;;  %v945_v46 = vsel %vm482_vm0, %v907_v19, 0.0  ;;  %v1504_v0 = vrot.slane %v2776_v33, 6  ;;  %v1505_v31 = vrot.slane %v2776_v33, 7 }
 0x373   : > { %v2830_v40 = vsel %vm557_vm1, %v923_v1, %v916_v24  ;;  %v1458_v44 = vrot.slane %v1457_v13, 2  ;;  %v946_v38 = vrot.slane %v945_v46, 4  ;;  %v1648_v53 = vrot.slane %v2809_v17, %v2793_v55  ;;  %v895_v11 = vpop.permute.xlu1 %894 }
 0x374   : > { %v1636_v47 = vsel %vm565_vm5, %v1623_v20, %v1635_v62  ;;  %v1441_v42 = vsel %vm482_vm0, %v1433_v56, 0.0  ;;  %v1644_v35 = vrot.slane %v1396_v63, %v2793_v55  ;;  %v936_v29 = vrot.slane %v935_v26, 1  ;;  %v1416_v30 = vpop.permute.xlu0 %1415 }
 0x375   : > { %v1453_v57 = vrot.slane %v1452_v50, 1  ;;  %v1652_v48 = vrot.slane %v1406_v14, %v2793_v55  ;;  %v1442_v15 = vrot.slane %v1441_v42, 4  ;;  %v2844_v45 = vadd.f32 %v1500_v25, %v2827_v12 }
 0x376   : > { %v943_v6 = vrot.slane %v942_v28, 1  ;;  %v1673_v17 = vsel %vm557_vm1, %v1648_v53, %v1644_v35  ;;  %v1436_v62 = vmul.f32 %v1411_v49, %v1388_v54  ;;  %v1515_v61 = vadd.f32 %v1499_v37, %v923_v1 }
 0x377   : > { %v1459_v22 = vadd.f32 %v1458_v44, %v1457_v13  ;;  %v947_v39 = vadd.f32 %v946_v38, %v945_v46  ;;  %v1443_v32 = vadd.f32 %v1442_v15, %v1441_v42  ;;  %v1674_v14 = vsel %vm559_vm2, %v1652_v48, %v1673_v17  ;;  %v2865_v19 = vpop.permute.xlu1 %899 }
 0x378   : > { %v1462_v21 = vsel %vm482_vm0, %v1436_v62, 0.0  ;;  %v1656_v16 = vrot.slane %v1411_v49, %v2793_v55  ;;  %v908_v25 = vmul.f32 %v895_v11, %v860_v18  ;;  %v2856_v27 = vadd.f32 %v936_v29, %v935_v26 }
 0x379   : > { %v2858_v51 = vadd.f32 %v1453_v57, %v1452_v50  ;;  %v1444_v54 = vrot.slane %v1443_v32, 2  ;;  %v1463_v63 = vrot.slane %v1462_v21, 4  ;;  %v2860_v37 = vadd.f32 %v943_v6, %v942_v28 }
 0x37a   : > { %v1675_v3 = vsel %vm561_vm3, %v1656_v16, %v1674_v14  ;;  %v952_v58 = vsel %vm482_vm0, %v908_v25, 0.0  ;;  %v1627_v1 = vrot.slane %v895_v11, %v2784_v10  ;;  %v1460_v20 = vrot.slane %v1459_v22, 1  ;;  %v1421_v11 = vpop.permute.xlu0 %1420 }
 0x37b   : > { %v948_v36 = vrot.slane %v947_v39, 2  ;;  %v1445_v18 = vadd.f32 %v1444_v54, %v1443_v32  ;;  %v1464_v13 = vadd.f32 %v1463_v63, %v1462_v21  ;;  %v953_v26 = vrot.slane %v952_v58, 4  ;;  %v2889_v59 = vpop.permute.xlu1 %1425 }
 0x37c   : > { %v2868_v50 = vsel %vm567_vm6, %v1627_v1, %v1636_v47  ;;  %v1437_v56 = vmul.f32 %v1416_v30, %v1389_v34  ;;  %v1660_v28 = vrot.slane %v1416_v30, %v2793_v55  ;;  %v1514_v46 = vadd.f32 %v2776_v33, %v916_v24 }
 0x37d   : > { %v1523_v49 = vsub.f32 %v1515_v61, %v2858_v51  ;;  %v1446_v44 = vrot.slane %v1445_v18, 1  ;;  %v1465_v38 = vrot.slane %v1464_v13, 2  ;;  %v954_v53 = vadd.f32 %v953_v26, %v952_v58 }
 0x37e   : > { %v1469_v42 = vsel %vm482_vm0, %v1437_v56, 0.0  ;;  %v1676_v35 = vsel %vm563_vm4, %v1660_v28, %v1675_v3  ;;  %v909_v47 = vmul.f32 %v2865_v19, %v861_v43  ;;  %v1517_v9 = vadd.f32 %v1501_v41, %v2856_v27  ;;  %v2902_v3 = vpop.permute.xlu0 %1430 }
 0x37f   : > { %v1461_v34 = vadd.f32 %v1460_v20, %v1459_v22  ;;  %v949_v24 = vadd.f32 %v948_v36, %v947_v39  ;;  %v1466_v29 = vadd.f32 %v1465_v38, %v1464_v13  ;;  %v2886_v57 = vadd.f32 %v1502_v2, %v2860_v37 }
 0x380   : > { %v955_v48 = vrot.slane %v954_v53, 2  ;;  %v1470_v15 = vrot.slane %v1469_v42, 4  ;;  %v959_v6 = vsel %vm482_vm0, %v909_v47, 0.0  ;;  %v1531_v43 = vand.u32 2147483647, %v1523_v49 }
 0x381   : > { %v1447_v17 = vadd.f32 %v1446_v44, %v1445_v18  ;;  %v1467_v62 = vrot.slane %v1466_v29, 1  ;;  %v960_v61 = vrot.slane %v959_v6, 4  ;;  %v1438_v22 = vmul.f32 %v1421_v11, %v1390_v8 }
 0x382   : > { %v956_v32 = vadd.f32 %v955_v48, %v954_v53  ;;  %v1471_v41 = vadd.f32 %v1470_v15, %v1469_v42  ;;  %v1664_v39 = vrot.slane %v1421_v11, %v2793_v55  ;;  %v1524_v2 = vsub.f32 %v2844_v45, %v1461_v34 }
 0x383   : > { %v950_v14 = vrot.slane %v949_v24, 1  ;;  %v961_v21 = vadd.f32 %v960_v61, %v959_v6  ;;  %v1439_v16 = vmul.f32 %v2889_v59, %v1391_v7  ;;  %v1468_v25 = vadd.f32 %v1467_v62, %v1466_v29 }
 0x384   : > { %v1472_v30 = vrot.slane %v1471_v41, 2  ;;  %v1476_v54 = vsel %vm482_vm0, %v1438_v22, 0.0  ;;  %v2900_v63 = vsel %vm565_vm5, %v1664_v39, %v1676_v35  ;;  %v957_v52 = vrot.slane %v956_v32, 1 }
 0x385   : > { %v962_v8 = vrot.slane %v961_v21, 2  ;;  %v1477_v58 = vrot.slane %v1476_v54, 4  ;;  %v1483_v45 = vsel %vm482_vm0, %v1439_v16, 0.0  ;;  %v1546_v1 = vrot.slane %v1531_v43, 7 }
 0x386   : > { %v1522_v20 = vsub.f32 %v1514_v46, %v1447_v17  ;;  %v1473_v36 = vadd.f32 %v1472_v30, %v1471_v41  ;;  %v1484_v60 = vrot.slane %v1483_v45, 4  ;;  %v1532_v18 = vand.u32 2147483647, %v1524_v2 }
 0x387   : > { %v951_v7 = vadd.f32 %v950_v14, %v949_v24  ;;  %v1478_v13 = vadd.f32 %v1477_v58, %v1476_v54  ;;  %v1440_v26 = vmul.f32 %v2902_v3, %v1392_v4  ;;  %v1589_v56 = vsel %vm557_vm1, %v2858_v51, %v1447_v17 }
 0x388   : > { %v1474_v28 = vrot.slane %v1473_v36, 1  ;;  %v963_v49 = vadd.f32 %v962_v8, %v961_v21  ;;  %v1485_v44 = vadd.f32 %v1484_v60, %v1483_v45  ;;  %v1525_v38 = vsub.f32 %v1517_v9, %v1468_v25 }
 0x389   : > { %v958_v53 = vadd.f32 %v957_v52, %v956_v32  ;;  %v1479_v42 = vrot.slane %v1478_v13, 2  ;;  %v1490_v46 = vsel %vm482_vm0, %v1440_v26, 0.0  ;;  %v1530_v35 = vand.u32 2147483647, %v1522_v20 }
 0x38a   : > { %v1475_v47 = vadd.f32 %v1474_v28, %v1473_v36  ;;  %v1486_v11 = vrot.slane %v1485_v44, 2  ;;  %v1491_v24 = vrot.slane %v1490_v46, 4  ;;  %v1548_v29 = vrot.slane %v1532_v18, 6 }
 0x38b   : > { %v1631_v23 = vrot.slane %v2865_v19, %v2784_v10  ;;  %v1480_v4 = vadd.f32 %v1479_v42, %v1478_v13  ;;  %v1590_v48 = vsel %vm559_vm2, %v1461_v34, %v1589_v56  ;;  %v964_v15 = vrot.slane %v963_v49, 1 }
 0x38c   : > { %v1526_v51 = vsub.f32 %v2886_v57, %v1475_v47  ;;  %v1487_v6 = vadd.f32 %v1486_v11, %v1485_v44  ;;  %v1492_v9 = vadd.f32 %v1491_v24, %v1490_v46  ;;  %v1519_v43 = vadd.f32 %v1503_v5, %v951_v7 }
 0x38d   : > { %v1533_v17 = vand.u32 2147483647, %v1525_v38  ;;  %v1520_v62 = vadd.f32 %v1504_v0, %v958_v53  ;;  %v1481_v61 = vrot.slane %v1480_v4, 1  ;;  %v1591_v10 = vsel %vm561_vm3, %v1468_v25, %v1590_v48 }
 0x38e   : > { %v1488_v32 = vrot.slane %v1487_v6, 1  ;;  %v1493_v41 = vrot.slane %v1492_v9, 2  ;;  %v1547_v19 = vsel %vm557_vm1, %v1546_v1, %v1530_v35  ;;  %v1534_v34 = vand.u32 2147483647, %v1526_v51 }
 0x38f   : > { %v1482_v22 = vadd.f32 %v1481_v61, %v1480_v4  ;;  %v1574_v57 = vsel %vm559_vm2, %v2827_v12, %v2830_v40  ;;  %v1638_v5 = vsel %vm569_vm7, %v1631_v23, %v2868_v50  ;;  %v965_v39 = vadd.f32 %v964_v15, %v963_v49 }
 0x390   : > { %v1494_v2 = vadd.f32 %v1493_v41, %v1492_v9  ;;  %v1489_v14 = vadd.f32 %v1488_v32, %v1487_v6  ;;  %v1575_v0 = vsel %vm561_vm3, %v2856_v27, %v1574_v57  ;;  %v1550_v21 = vrot.slane %v1533_v17, 5 }
 0x391   : > { %v1527_v16 = vsub.f32 %v1519_v43, %v1482_v22  ;;  %v1592_v25 = vsel %vm563_vm4, %v1475_v47, %v1591_v10  ;;  %v1576_v30 = vsel %vm563_vm4, %v2860_v37, %v1575_v0  ;;  %v1549_v40 = vsel %vm559_vm2, %v1548_v29, %v1547_v19 }
 0x392   : > { %v1495_v54 = vrot.slane %v1494_v2, 1  ;;  %v1593_v52 = vsel %vm565_vm5, %v1482_v22, %v1592_v25  ;;  %v1528_v12 = vsub.f32 %v1520_v62, %v1489_v14  ;;  %v1552_v50 = vrot.slane %v1534_v34, 4 }
 0x393   : > { %v1594_v8 = vsel %vm567_vm6, %v1489_v14, %v1593_v52  ;;  %v1535_v58 = vand.u32 2147483647, %v1527_v16  ;;  %v1577_v45 = vsel %vm565_vm5, %v951_v7, %v1576_v30  ;;  %v1521_v1 = vadd.f32 %v1505_v31, %v965_v39 }
 0x394   : > { %v1496_v27 = vadd.f32 %v1495_v54, %v1494_v2  ;;  %v1536_v20 = vand.u32 2147483647, %v1528_v12  ;;  %v1578_v36 = vsel %vm567_vm6, %v958_v53, %v1577_v45  ;;  %v1551_v26 = vsel %vm561_vm3, %v1550_v21, %v1549_v40 }
 0x395   : > { %v1554_v37 = vrot.slane %v1535_v58, 3  ;;  %v1579_v60 = vsel %vm569_vm7, %v965_v39, %v1578_v36  ;;  %v1553_v7 = vsel %vm563_vm4, %v1552_v50, %v1551_v26  ;;  %v1668_v53 = vrot.slane %v2889_v59, %v2793_v55 }
 0x396   : > { %v1595_v18 = vsel %vm569_vm7, %v1496_v27, %v1594_v8  ;;  %v1529_v13 = vsub.f32 %v1521_v1, %v1496_v27  ;;  %v1556_v56 = vrot.slane %v1536_v20, 2  ;;  %v1672_v42 = vrot.slane %v2902_v3, %v2793_v55 }
 0x397   : > { %1596 = vrot.lane.b32.xlu0 %v1595_v18, %s2120_s7  ;;  %v1555_v33 = vsel %vm565_vm5, %v1554_v37, %v1553_v7  ;;  %v1678_v46 = vsel %vm567_vm6, %v1668_v53, %v2900_v63 }
 0x398   : > { %v1537_v28 = vand.u32 2147483647, %v1529_v13  ;;  %v1557_v31 = vsel %vm567_vm6, %v1556_v56, %v1555_v33  ;;  %v1679_v11 = vsel %vm569_vm7, %v1672_v42, %v1678_v46 }
 0x39a   : > { %v1558_v49 = vrot.slane %v1537_v28, 1 }
 0x39c   : > { %v1559_v44 = vsel %vm569_vm7, %v1558_v49, %v1557_v31 }
 0x39d   : > { %v1561_v38 = vsel %vm482_vm0, %v1559_v44, 0.0 }
 0x39e   : > { %1562 = vadd.xlane.f32.xlu1 %v1561_v38 }
 0x409   : > { %v1597_v35 = vpop.permute.xlu0 %1596 }
 0x40a   : > { %v1681_v47 = vsel %vm482_vm0, %v1579_v60, %v1597_v35 }
 0x40b   : > { %v1683_v24 = vsel %vm1682_vm9, %v1681_v47, %v1638_v5 }
 0x40c   : > { %v1685_v29 = vsel %vm1684_vm10, %v1683_v24, %v1679_v11 }
 0x427   : > { %v1563_v59 = vpop.xlane.xlu1 %1562 }
 0x428   : > { %v1564_v55 = vsub.f32 0.0, %v1563_v59 }
 0x42a   : > { %v1687_v63 = vsel %vm1686_vm11, %v1685_v29, %v1564_v55 }
 0x42b   : > { %v1689_v3 = vsel %vm1688_vm12, %v1687_v63, 0.0 }
 0x42c   : > { %1690 = vst [vmem:[%s284_s30] sm:$0xff] %v1689_v3 }
 0x42d   : > { %2057 = shalt.err (!%p2054_p11)
}
 0x42e   : > { %s2058_s8 = scalar_lea.hbm %s2959_s20, 128  ;;  %s2062_s29 = scalar_lea.hbm %s3000_s4, 256 }
 0x42f   : > { %p2059_p3 = scmp.ne.s32.totalorder %s2959_s20, %s2058_s8  ;;  %p2063_p6 = scmp.lt.s32.totalorder %s2959_s20, %s3000_s4 }
 0x430   : > { %p2064_p13 = scmp.lt.s32.totalorder %s2062_s29, %s2058_s8 }
 0x431   : > { %p2060_p5 = pnand %p2059_p3, %p3022_p7 }
 0x432   : > { %p2065_p1 = por %p2064_p13, %p2063_p6 }
 0x433   : > { %p2061_p8 = pneg %p2060_p5 }
 0x435   : > { %p2066_p12 = pnand %p2065_p1, %p2061_p8 }
 0x437   : > { %2069 = shalt.err (!%p2066_p12)
}
 0x438   : > { %1868 = dma.vmem_to_hbm [thread:$0]  (%p3022_p7), %s1706_s23, 128, %s2959_s20, %s1692_s22  }
 0x439 PF: > { %s1717_s12 = sand.u32 1, %s2100_s15   ;;  %p3023_p10 = scmp.ne.s32.totalorder %s3012_s28, 0 }
 0x43a   : > { %p3024_p0 = scmp.ge.s32.totalorder %s2112_s18, 2  ;;  %s1718_s14 = scalar_lea.sflag [#allocation4], %s1717_s12 }
 0x43c   : > { %p1878_p2 = pnand %p3024_p0, %p3023_p10 }
 0x43e   : > { %p1879_p4 = pneg %p1878_p2 }
 0x440   : > { %2095 = dma.done.wait (%p1879_p4), %s1718_s14, 128  }
 0x441   : > { %2097 = vsyncadd (%p1879_p4), %s1718_s14, 4294967168  ;;  %p20_p9 = scmp.ge.s32.totalorder %s2172_s21, 4   ;;  %s3025_s15 = smov %s2104_s16 }
 0x442   : > { %s3026_s16 = smov %s2108_s17  ;;  %s3027_s17 = smov %s2184_s24 }
 0x443   : > { %s3028_s18 = smov %s2172_s21  ;;  %22 = sbr.rel (!%p20_p9) target bundleno = 7 (0x7), region = 102 }
 0x448   :  { %1723 = vsyncpa [#allocation3], 1 }
 0x449   :  { %1725 = vsyncpa [#allocation3 + $0x1], 1 }
 0x44a   :  { %1726 = vsyncpa [#allocation6], 1 }
 0x44b   :  { %1728 = vsyncpa [#allocation6 + $0x1], 1 }
 0x44c   :  { %1729 = vsyncpa [#allocation4], 1 }
 0x44d   :  { %1731 = vsyncpa [#allocation4 + $0x1], 1 }

</bundles_post_ra>
